<compile_context>
chip_gen: v7x
topology: tpu7x:2x2x1
jax: 0.10.0
libtpu: 0.0.40
codegen_flags: <defaults>
</compile_context>

<pallas_src>
import functools

import jax
import jax.numpy as jnp
import numpy as np
from jax import lax
from jax.experimental import pallas as pl
from jax.experimental.pallas import tpu as pltpu


def _rotation_attention_kernel(inv_temperature,
                               q_ref, k_ref, v6_ref,
                               we_ref, be_ref,
                               w1_ref, b1_ref,
                               w2_ref, b2_ref,
                               r_ref):
    # Attention scores: Q [TM, d] x K [m*m, d] -> [TM, m*m]
    # NT matmul via dot_general: MXU consumes K in stored layout, no XLU transpose.
    scores = lax.dot_general(
        q_ref[...], k_ref[...],
        dimension_numbers=(((1,), (1,)), ((), ())),
        preferred_element_type=jnp.float32) * inv_temperature

    # Row-wise softmax (max-subtracted); denominator on the otherwise-idle EUP.
    scores = scores - jnp.max(scores, axis=-1, keepdims=True)
    exps = jnp.exp(scores)
    weights = exps * pl.reciprocal(jnp.sum(exps, axis=-1, keepdims=True),
                                   approx=True)

    # Reassociated value path: (attn @ V6) @ W_enc + b_enc.
    # Exact because each softmax row sums to 1, so the encoder bias passes through.
    small = jnp.dot(weights, v6_ref[...], preferred_element_type=jnp.float32)
    out = jnp.dot(small, we_ref[...], preferred_element_type=jnp.float32) + be_ref[...]

    # Decoder MLP: Linear -> ReLU -> Linear. W2/b2 are zero-padded to 128 lanes
    # so the output store is a full-lane (unmasked) vst.
    h = jnp.dot(out, w1_ref[...], preferred_element_type=jnp.float32) + b1_ref[...]
    h = jnp.maximum(h, 0.0)
    r_ref[...] = jnp.dot(h, w2_ref[...],
                         preferred_element_type=jnp.float32) + b2_ref[...]


def rotation_attention_core(Q_rows, K, V6, W_enc, b_enc, W1, b1, W2_pad, b2_pad,
                            temperature, tile_m=128):
    """Runs the hot path for all stacked query rows.

    Q_rows : [n_rows, d_model]  (all batch images' Q rows stacked)
    K      : [m*m, d_model]     (shared across the batch)
    V6     : [m*m, 6]           (shared across the batch)
    Returns: [n_rows, 6]
    """
    n_rows, d_model = Q_rows.shape
    mm = K.shape[0]
    hidden = W1.shape[1]
    out_w = W2_pad.shape[1]  # lane-dense output width (128)

    # Pad stacked rows up to a multiple of the row tile. Zero rows softmax to a
    # uniform distribution (no NaN) and are sliced off afterwards.
    n_pad = -(-n_rows // tile_m) * tile_m
    if n_pad != n_rows:
        Q_rows = jnp.pad(Q_rows, ((0, n_pad - n_rows), (0, 0)))

    kernel = functools.partial(_rotation_attention_kernel,
                               float(1.0 / temperature))

    grid_spec = pltpu.PrefetchScalarGridSpec(
        num_scalar_prefetch=0,
        grid=(n_pad // tile_m,),
        in_specs=[
            # Per-step query row tile.
            pl.BlockSpec((tile_m, d_model), lambda b: (b, 0)),
            # Everything below is resident in VMEM (constant block index -> one DMA).
            pl.BlockSpec((mm, d_model), lambda b: (0, 0)),      # K
            pl.BlockSpec((mm, 6), lambda b: (0, 0)),            # V6
            pl.BlockSpec((6, d_model), lambda b: (0, 0)),       # W_enc
            pl.BlockSpec((1, d_model), lambda b: (0, 0)),       # b_enc
            pl.BlockSpec((d_model, hidden), lambda b: (0, 0)),  # W1
            pl.BlockSpec((1, hidden), lambda b: (0, 0)),        # b1
            pl.BlockSpec((hidden, out_w), lambda b: (0, 0)),    # W2 (zero-padded)
            pl.BlockSpec((1, out_w), lambda b: (0, 0)),         # b2 (zero-padded)
        ],
        out_specs=pl.BlockSpec((tile_m, out_w), lambda b: (b, 0)),
    )

    r_pad = pl.pallas_call(
        kernel,
        out_shape=jax.ShapeDtypeStruct((n_pad, out_w), jnp.float32),
        grid_spec=grid_spec,
        compiler_params=pltpu.CompilerParams(
            dimension_semantics=("parallel",)),
    )(Q_rows, K, V6, W_enc, b_enc, W1, b1, W2_pad, b2_pad)

    return r_pad[:n_rows, :6]


def _normalize(x, eps=1e-12):
    # Matches F.normalize(p=2, dim=1): x / max(||x||, eps)
    n = jnp.maximum(jnp.linalg.norm(x, axis=1, keepdims=True), eps)
    return x / n


def recover_R(r):
    r1, r2 = r[:, :3], r[:, 3:]
    r2 = r2 - jnp.sum(r1 * r2, axis=1, keepdims=True) * r1
    r3 = jnp.cross(r1, r2)
    r1 = _normalize(r1)
    r2 = _normalize(r2)
    r3 = _normalize(r3)
    return jnp.concatenate([r1, r2, r3], axis=1)


def rotation_attention_forward(params, img_feature, refer_feature, refer_r,
                               temperature=0.1, use_pallas=True):
    """Batched forward: img_feature [B, d_model] (B independent query images,
    each processed exactly like the original single-image module forward)."""
    img_feature = jnp.atleast_2d(img_feature)
    B = img_feature.shape[0]
    m, d_model = refer_feature.shape

    # Q rows for every image, stacked: [B*m, d_model]
    Q = img_feature[:, None, :] - refer_feature[None, :, :]
    Q_rows = Q.reshape(B * m, d_model)

    # K = pairwise reference differences (shared across the batch) -> [m*m, d_model]
    K = (refer_feature[:, None, :] - refer_feature[None, :, :]).reshape(m * m, d_model)

    # V = (R_i @ R_j^-1) for all pairs, keep first 6 entries -> [m*m, 6]
    R_ref = refer_r.reshape(m, 3, 3)
    R_inv = jnp.linalg.inv(R_ref)
    V_full = jnp.matmul(R_ref[:, None, :, :], R_inv[None, :, :, :])  # [m, m, 3, 3]
    V6 = V_full.reshape(m * m, 9)[:, :6]

    if use_pallas:
        r = rotation_attention_core(Q_rows, K, V6,
                                    params["W_enc"], params["b_enc"],
                                    params["W1"], params["b1"],
                                    params["W2_pad"], params["b2_pad"],
                                    temperature)
    else:
        # Pure-JAX reference of the kernel body (for correctness checking).
        V = V6 @ params["W_enc"] + params["b_enc"]
        scores = (Q_rows @ K.T) / temperature
        weights = jax.nn.softmax(scores, axis=-1)
        out = weights @ V
        h = jnp.maximum(out @ params["W1"] + params["b1"], 0.0)
        r = (h @ params["W2_pad"] + params["b2_pad"])[:, :6]

    R = recover_R(r).reshape(B, m, 3, 3)
    R = jnp.matmul(R, R_ref[None, :, :, :])
    return R


def make_params(key, d_model, hidden_size, out_lanes=128):
    k1, k2, k3, k4, k5, k6 = jax.random.split(key, 6)
    scale_enc = 1.0 / np.sqrt(6.0)
    scale_d1 = 1.0 / np.sqrt(d_model)
    scale_d2 = 1.0 / np.sqrt(hidden_size)
    # rot_decoder layer 2: Linear(hidden_size, 6), zero-padded to 128 output lanes
    W2 = jax.random.uniform(k5, (hidden_size, 6), jnp.float32, -scale_d2, scale_d2)
    b2 = jax.random.uniform(k6, (1, 6), jnp.float32, -scale_d2, scale_d2)
    W2_pad = jnp.concatenate(
        [W2, jnp.zeros((hidden_size, out_lanes - 6), jnp.float32)], axis=1)
    b2_pad = jnp.concatenate(
        [b2, jnp.zeros((1, out_lanes - 6), jnp.float32)], axis=1)
    return {
        # rot_encoder: Linear(6, d_model); stored as [in, out]
        "W_enc": jax.random.uniform(k1, (6, d_model), jnp.float32,
                                    -scale_enc, scale_enc),
        "b_enc": jax.random.uniform(k2, (1, d_model), jnp.float32,
                                    -scale_enc, scale_enc),
        # rot_decoder layer 1: Linear(d_model, hidden_size)
        "W1": jax.random.uniform(k3, (d_model, hidden_size), jnp.float32,
                                 -scale_d1, scale_d1),
        "b1": jax.random.uniform(k4, (1, hidden_size), jnp.float32,
                                 -scale_d1, scale_d1),
        "W2_pad": W2_pad,
        "b2_pad": b2_pad,
    }


def make_random_rotations(key, m):
    # Random orthogonal 3x3 matrices (invertible), flattened to [m, 9].
    A = jax.random.normal(key, (m, 3, 3), jnp.float32)
    Qm, _ = jnp.linalg.qr(A)
    return Qm.reshape(m, 9)


if __name__ == "__main__":
    B = 32            # batch of query images (stacked -> 256 Q rows, grid=(2,))
    m = 8             # number of reference views
    d_model = 128     # feature dimension (small synthetic version of 512)
    hidden_size = 128
    temperature = 0.1

    key = jax.random.PRNGKey(0)
    k_params, k_img, k_ref, k_rot = jax.random.split(key, 4)

    params = make_params(k_params, d_model, hidden_size)
    img_feature = jax.random.normal(k_img, (B, d_model), jnp.float32)
    refer_feature = jax.random.normal(k_ref, (m, d_model), jnp.float32)
    refer_r = make_random_rotations(k_rot, m)                 # [m, 9]

    fwd_pallas = jax.jit(functools.partial(
        rotation_attention_forward, temperature=temperature, use_pallas=True))
    fwd_ref = jax.jit(functools.partial(
        rotation_attention_forward, temperature=temperature, use_pallas=False))

    out = jax.block_until_ready(fwd_pallas(params, img_feature, refer_feature, refer_r))
    ref = jax.block_until_ready(fwd_ref(params, img_feature, refer_feature, refer_r))

    assert out.shape == (B, m, 3, 3), out.shape
    # Tolerance slightly looser than f32-exact because the kernel uses the EUP
    # approximate reciprocal for the softmax denominator (per perf review).
    np.testing.assert_allclose(np.asarray(out), np.asarray(ref),
                               rtol=2e-3, atol=2e-3)
    print("KERNEL_OK")
</pallas_src>

<mosaic_0001>
module attributes {stable_mosaic.version = 11 : i64} {
  func.func @_rotation_attention_kernel(%arg0: i32, %arg1: memref<128x128xf32, #tpu.memory_space<vmem>>, %arg2: memref<64x128xf32, #tpu.memory_space<vmem>>, %arg3: memref<64x6xf32, #tpu.memory_space<vmem>>, %arg4: memref<6x128xf32, #tpu.memory_space<vmem>>, %arg5: memref<1x128xf32, #tpu.memory_space<vmem>>, %arg6: memref<128x128xf32, #tpu.memory_space<vmem>>, %arg7: memref<1x128xf32, #tpu.memory_space<vmem>>, %arg8: memref<128x128xf32, #tpu.memory_space<vmem>>, %arg9: memref<1x128xf32, #tpu.memory_space<vmem>>, %arg10: memref<128x128xf32, #tpu.memory_space<vmem>>) attributes {dimension_semantics = [#tpu.dimension_semantics<parallel>], iteration_bounds = array<i64: 2>, scalar_prefetch = 0 : i64, scratch_operands = 0 : i64, tpu.core_type = #tpu.core_type<tc>, window_params = [{transform_indices = @transform_0, window_bounds = array<i64: 128, 128>}, {pipeline_mode = #tpu.pipeline_mode<synchronous>, transform_indices = @transform_1, window_bounds = array<i64: 64, 128>}, {pipeline_mode = #tpu.pipeline_mode<synchronous>, transform_indices = @transform_2, window_bounds = array<i64: 64, 6>}, {pipeline_mode = #tpu.pipeline_mode<synchronous>, transform_indices = @transform_3, window_bounds = array<i64: 6, 128>}, {pipeline_mode = #tpu.pipeline_mode<synchronous>, transform_indices = @transform_4, window_bounds = array<i64: 1, 128>}, {pipeline_mode = #tpu.pipeline_mode<synchronous>, transform_indices = @transform_5, window_bounds = array<i64: 128, 128>}, {pipeline_mode = #tpu.pipeline_mode<synchronous>, transform_indices = @transform_6, window_bounds = array<i64: 1, 128>}, {pipeline_mode = #tpu.pipeline_mode<synchronous>, transform_indices = @transform_7, window_bounds = array<i64: 128, 128>}, {pipeline_mode = #tpu.pipeline_mode<synchronous>, transform_indices = @transform_8, window_bounds = array<i64: 1, 128>}, {transform_indices = @transform_9, window_bounds = array<i64: 128, 128>}]} {
    %c0 = arith.constant 0 : index
    %c0_0 = arith.constant 0 : index
    %0 = vector.load %arg1[%c0, %c0_0] : memref<128x128xf32, #tpu.memory_space<vmem>>, vector<128x128xf32>
    %c0_1 = arith.constant 0 : index
    %c0_2 = arith.constant 0 : index
    %1 = vector.load %arg2[%c0_1, %c0_2] : memref<64x128xf32, #tpu.memory_space<vmem>>, vector<64x128xf32>
    %cst = arith.constant dense<0.000000e+00> : vector<128x64xf32>
    %2 = tpu.matmul %0, %1, %cst {dimension_numbers = #tpu.dot_dimension_numbers<[1], [1], [0], [0], [0, 0, 1, 0], [], []>} : vector<128x128xf32>, vector<64x128xf32>, vector<128x64xf32> -> vector<128x64xf32>
    %cst_3 = arith.constant 1.000000e+01 : f32
    %3 = vector.broadcast %cst_3 : f32 to vector<128x64xf32>
    %4 = arith.mulf %2, %3 : vector<128x64xf32>
    %cst_4 = arith.constant dense<0xFF800000> : vector<128xf32>
    %5 = vector.multi_reduction <maximumf>, %4, %cst_4 [1] : vector<128x64xf32> to vector<128xf32>
    %6 = vector.shape_cast %5 : vector<128xf32> to vector<128x1xf32>
    %7 = vector.broadcast %6 : vector<128x1xf32> to vector<128x64xf32>
    %8 = arith.subf %4, %7 : vector<128x64xf32>
    %9 = math.exp %8 : vector<128x64xf32>
    %cst_5 = arith.constant dense<0.000000e+00> : vector<128xf32>
    %10 = vector.multi_reduction <add>, %9, %cst_5 [1] : vector<128x64xf32> to vector<128xf32>
    %11 = vector.shape_cast %10 : vector<128xf32> to vector<128x1xf32>
    %12 = tpu.reciprocal %11 {approx = true} : vector<128x1xf32> -> vector<128x1xf32>
    %13 = vector.broadcast %12 : vector<128x1xf32> to vector<128x64xf32>
    %14 = arith.mulf %9, %13 : vector<128x64xf32>
    %c0_6 = arith.constant 0 : index
    %c0_7 = arith.constant 0 : index
    %15 = vector.load %arg3[%c0_6, %c0_7] : memref<64x6xf32, #tpu.memory_space<vmem>>, vector<64x6xf32>
    %cst_8 = arith.constant dense<0.000000e+00> : vector<128x6xf32>
    %16 = tpu.matmul %14, %15, %cst_8 {dimension_numbers = #tpu.dot_dimension_numbers<[1], [0], [0], [1], [0, 0, 1, 1], [], []>} : vector<128x64xf32>, vector<64x6xf32>, vector<128x6xf32> -> vector<128x6xf32>
    %c0_9 = arith.constant 0 : index
    %c0_10 = arith.constant 0 : index
    %17 = vector.load %arg4[%c0_9, %c0_10] : memref<6x128xf32, #tpu.memory_space<vmem>>, vector<6x128xf32>
    %cst_11 = arith.constant dense<0.000000e+00> : vector<128x128xf32>
    %18 = tpu.matmul %16, %17, %cst_11 {dimension_numbers = #tpu.dot_dimension_numbers<[1], [0], [0], [1], [0, 0, 1, 1], [], []>} : vector<128x6xf32>, vector<6x128xf32>, vector<128x128xf32> -> vector<128x128xf32>
    %c0_12 = arith.constant 0 : index
    %c0_13 = arith.constant 0 : index
    %19 = vector.load %arg5[%c0_12, %c0_13] : memref<1x128xf32, #tpu.memory_space<vmem>>, vector<1x128xf32>
    %20 = vector.broadcast %19 : vector<1x128xf32> to vector<128x128xf32>
    %21 = arith.addf %18, %20 : vector<128x128xf32>
    %c0_14 = arith.constant 0 : index
    %c0_15 = arith.constant 0 : index
    %22 = vector.load %arg6[%c0_14, %c0_15] : memref<128x128xf32, #tpu.memory_space<vmem>>, vector<128x128xf32>
    %cst_16 = arith.constant dense<0.000000e+00> : vector<128x128xf32>
    %23 = tpu.matmul %21, %22, %cst_16 {dimension_numbers = #tpu.dot_dimension_numbers<[1], [0], [0], [1], [0, 0, 1, 1], [], []>} : vector<128x128xf32>, vector<128x128xf32>, vector<128x128xf32> -> vector<128x128xf32>
    %c0_17 = arith.constant 0 : index
    %c0_18 = arith.constant 0 : index
    %24 = vector.load %arg7[%c0_17, %c0_18] : memref<1x128xf32, #tpu.memory_space<vmem>>, vector<1x128xf32>
    %25 = vector.broadcast %24 : vector<1x128xf32> to vector<128x128xf32>
    %26 = arith.addf %23, %25 : vector<128x128xf32>
    %cst_19 = arith.constant 0.000000e+00 : f32
    %27 = vector.broadcast %cst_19 : f32 to vector<128x128xf32>
    %28 = arith.maximumf %26, %27 : vector<128x128xf32>
    %c0_20 = arith.constant 0 : index
    %c0_21 = arith.constant 0 : index
    %29 = vector.load %arg8[%c0_20, %c0_21] : memref<128x128xf32, #tpu.memory_space<vmem>>, vector<128x128xf32>
    %cst_22 = arith.constant dense<0.000000e+00> : vector<128x128xf32>
    %30 = tpu.matmul %28, %29, %cst_22 {dimension_numbers = #tpu.dot_dimension_numbers<[1], [0], [0], [1], [0, 0, 1, 1], [], []>} : vector<128x128xf32>, vector<128x128xf32>, vector<128x128xf32> -> vector<128x128xf32>
    %c0_23 = arith.constant 0 : index
    %c0_24 = arith.constant 0 : index
    %31 = vector.load %arg9[%c0_23, %c0_24] : memref<1x128xf32, #tpu.memory_space<vmem>>, vector<1x128xf32>
    %32 = vector.broadcast %31 : vector<1x128xf32> to vector<128x128xf32>
    %33 = arith.addf %30, %32 : vector<128x128xf32>
    %c0_25 = arith.constant 0 : index
    %c0_26 = arith.constant 0 : index
    %34 = vector.load %arg10[%c0_25, %c0_26] : memref<128x128xf32, #tpu.memory_space<vmem>>, vector<128x128xf32>
    tpu.vector_store %arg10[%c0_25, %c0_26], %33 {strides = array<i32>} : memref<128x128xf32, #tpu.memory_space<vmem>>, vector<128x128xf32>,
    return
  }
  func.func @transform_0(%arg0: i32) -> (i32, i32) {
    %c0_i32 = arith.constant 0 : i32
    %c0_i32_0 = arith.constant 0 : i32
    return %arg0, %c0_i32 : i32, i32
  }
  func.func @transform_1(%arg0: i32) -> (i32, i32) {
    %c0_i32 = arith.constant 0 : i32
    %c0_i32_0 = arith.constant 0 : i32
    %c0_i32_1 = arith.constant 0 : i32
    return %c0_i32, %c0_i32_0 : i32, i32
  }
  func.func @transform_2(%arg0: i32) -> (i32, i32) {
    %c0_i32 = arith.constant 0 : i32
    %c0_i32_0 = arith.constant 0 : i32
    %c0_i32_1 = arith.constant 0 : i32
    return %c0_i32, %c0_i32_0 : i32, i32
  }
  func.func @transform_3(%arg0: i32) -> (i32, i32) {
    %c0_i32 = arith.constant 0 : i32
    %c0_i32_0 = arith.constant 0 : i32
    %c0_i32_1 = arith.constant 0 : i32
    return %c0_i32, %c0_i32_0 : i32, i32
  }
  func.func @transform_4(%arg0: i32) -> (i32, i32) {
    %c0_i32 = arith.constant 0 : i32
    %c0_i32_0 = arith.constant 0 : i32
    %c0_i32_1 = arith.constant 0 : i32
    return %c0_i32, %c0_i32_0 : i32, i32
  }
  func.func @transform_5(%arg0: i32) -> (i32, i32) {
    %c0_i32 = arith.constant 0 : i32
    %c0_i32_0 = arith.constant 0 : i32
    %c0_i32_1 = arith.constant 0 : i32
    return %c0_i32, %c0_i32_0 : i32, i32
  }
  func.func @transform_6(%arg0: i32) -> (i32, i32) {
    %c0_i32 = arith.constant 0 : i32
    %c0_i32_0 = arith.constant 0 : i32
    %c0_i32_1 = arith.constant 0 : i32
    return %c0_i32, %c0_i32_0 : i32, i32
  }
  func.func @transform_7(%arg0: i32) -> (i32, i32) {
    %c0_i32 = arith.constant 0 : i32
    %c0_i32_0 = arith.constant 0 : i32
    %c0_i32_1 = arith.constant 0 : i32
    return %c0_i32, %c0_i32_0 : i32, i32
  }
  func.func @transform_8(%arg0: i32) -> (i32, i32) {
    %c0_i32 = arith.constant 0 : i32
    %c0_i32_0 = arith.constant 0 : i32
    %c0_i32_1 = arith.constant 0 : i32
    return %c0_i32, %c0_i32_0 : i32, i32
  }
  func.func @transform_9(%arg0: i32) -> (i32, i32) {
    %c0_i32 = arith.constant 0 : i32
    %c0_i32_0 = arith.constant 0 : i32
    return %arg0, %c0_i32 : i32, i32
  }
}

</mosaic_0001>

<bundles_post_ra>
// kernel: custom-call.11
= control target key start
LH: loop header
LB: loop body
LE: loop exit
PB: predicated region body
PF: predicated region fallthrough
CT: control target
= control target key end

     0   :  { %5 = vsyncpa [#allocation5], 0  ;;  %s884_s0 = inlined_call_operand.vmem [shape: f32[8,3,3], index: 0, kind: input, shape index: {}]   ;;  %s885_s1 = inlined_call_operand.vmem [shape: f32[8,3,3], index: 1, kind: output, shape index: {0}]   ;;  %s886_s2 = inlined_call_operand.hbm [shape: s32[8,3], index: 2, kind: output, shape index: {1}]   ;;  %s887_s3 = inlined_call_operand.vmem [shape: s32[8,3], index: 3, kind: output, shape index: {2}]  }
   0x1   :  { %7 = vsyncpa [#allocation5 + $0x1], 0  ;;  %s704_s12 = smov 0   ;;  %s706_s13 = smov 0  }
   0x2   :  { %s708_s14 = smov 0   ;;  %s710_s15 = smov 0  }
   0x3 LB: > { %s725_s16 = sadd.s32 4294967295, %s676_s15   ;;  %s539_s17 = sadd.s32 4294967294, %s676_s15   ;;  %s676_s15 = sphi %s710_s15, %s895_s15   ;;  %s672_s14 = sphi %s708_s14, %s894_s14   ;;  %s668_s13 = sphi %s706_s13, %s893_s13   ;;  %s664_s12 = sphi %s704_s12, %s892_s12  }
   0x4   : > { %s729_s18 = sadd.s32 1, %s676_s15   ;;  %s17_s19 = sshrl.u32 %s676_s15, 3 }
   0x5   : > { %s18_s20 = sshrl.u32 %s729_s18, 3  ;;  %s22_s21 = sadd.s32 1, %s672_s14 }
   0x6   : > { %s19_s22 = ssub.s32 %s17_s19, %s18_s20  ;;  %p32_p0 = scmp.ne.s32.totalorder %s672_s14, %s668_s13 }
   0x7   : > { %p20_p1 = scmp.eq.s32.totalorder %s19_s22, 0  ;;  %p33_p2 = scmp.eq.s32.totalorder %s725_s16, 7 }
   0x8   : > { %p38_p3 = scmp.ne.s32.totalorder %s668_s13, %s664_s12  ;;  %p39_p4 = scmp.eq.s32.totalorder %s539_s17, 7 }
   0x9   : > { %s740_s23 = scalar_select %p20_p1, %s672_s14, %s22_s21  }
   0xa   : > { %p742_p5 = por %p33_p2, %p32_p0  ;;  %p746_p6 = por %p39_p4, %p38_p3 }
   0xb   : > { %p541_p7 = scmp.ge.s32.totalorder %s676_s15, 8 }
   0xc   : > { %s85_s26 = sand.u32 (!%p541_p7), 1, %s676_s15   ;;  %s543_s27 = sshll.u32 (!%p541_p7), %s676_s15, 2 }
   0xd   : > { %83 = sbr.rel (%p541_p7) target bundleno = 20 (0x14), region = 16  ;;  %s542_s28 = sshll.u32 (!%p541_p7), %s85_s26, 2 }
   0xe   : > { %s89_s4 = scalar_lea.vmem (!%p541_p7), %s884_s0, %s543_s27  ;;  %s87_s5 = scalar_lea.vmem (!%p541_p7), [#allocation1], %s542_s28 }
   0xf   : > { %v105_v0 = vld [vmem:[%s89_s4] sm:$0xf] (!%p541_p7) }
  0x10   : > { %106 = vst [vmem:[%s87_s5] sm:$0xf] (!%p541_p7), %v105_v0 }
  0x14 PF: > { %p544_p8 = scmp.ge.s32.totalorder %s676_s15, 1  ;;  %p122_p9 = scmp.lt.s32.totalorder %s676_s15, 9 }
  0x16   : > { %p123_p10 = pnand %p544_p8, %p122_p9 }
  0x18   : > { %126 = sbr.rel (%p123_p10) target bundleno = 441 (0x1b9), region = 50 }
  0x1f   : > { %s133_s6 = sand.u32 1, %s725_s16   ;;  %s144_s7 = sand.u32 1, %s668_s13   ;;  %v166_v1 = vlaneseq  ;;  %v682_v4 = vmov 0  }
  0x20   : > { %s760_s8 = sshll.u32 %s133_s6, 2  ;;  %s764_s9 = sshll.u32 %s144_s7, 3 }
  0x21   : > { %v767_v2 = vshrl.u32 %v166_v1, 7  ;;  %s135_s10 = scalar_lea.vmem [#allocation1], %s760_s8  ;;  %s161_s11 = sand.u32 7, %s725_s16  }
  0x22   : > { %v155_v3 = vld [vmem:[%s135_s10] sm:$0xf]  ;;  %s146_s17 = scalar_lea.vmem [#allocation4], %s764_s9  ;;  %s888_s20 = scalar_lea.vmem [#allocation6], %s764_s9 }
  0x23   : > { %156 = vst [vmem:[#allocation0] sm:$0xf] %v155_v3  ;;  %170 = vst [vmem:[#allocation7] sm:$0xff] %v767_v2  ;;  %s775_s19 = scalar_lea.vmem %s146_s17, %s161_s11 [#allocation4]  ;;  %s780_s21 = scalar_lea.vmem %s888_s20, %s161_s11 [#allocation6] }
  0x24   : > { %165 = vst [vmem:[%s775_s19] sm:$0x1] %v682_v4  ;;  %s139_s22 = scalar_lea.vmem [#allocation3], %s760_s8  ;;  %s784_s26 = smov 0  }
  0x2a   : > { %v159_v5 = vld [vmem:[#allocation0] sm:$0xff] }
  0x2b   : > { %160 = vst [vmem:[#allocation2] sm:$0xff] %v159_v5 }
  0x2c LB: >> { %vm186_vm0 = vcmp.lt.s32.totalorder %v767_v2, 3  ;;  %v791_v8 = vstv %s680_s26  ;;  %s227_s27 = ssub.s32 128, %s680_s26  ;;  %v233_v38 = vand.u32 127, %v166_v1  ;;  %v236_v40 = vld [vmem:[%s775_s19] ss:$0 sm:$0xff]  ;;  %s239_s28 = scalar_lea.vmem [#allocation2], %s680_s26  ;;  %s680_s26 = sphi %s784_s26, %s176_s26  }
  0x2d   : >> { %vm185_vm1 = vcmp.ge.s32.totalorder %v767_v2, %v791_v8  ;;  %s245_s30 = scalar_lea.vmem [#allocation7], %s680_s26  ;;  %vm265_vm15 = vcmp.gt.s32.totalorder %v767_v2, %v791_v8  ;;  %s176_s26 = sadd.s32 1, %s680_s26  }
  0x2e   : >> { %vm187_vm3 = vmand %vm185_vm1, %vm186_vm0  ;;  %vm257_vm12 = vcmp.gt.s32.totalorder %v233_v38, %v791_v8  ;;  %vm234_vm13 = vcmp.eq.s32.totalorder %v233_v38, %v791_v8  ;;  %v247_v42 = vld [vmem:[%s245_s30] ss:$0 sm:$0xff]  ;;  %p173_p11 = scmp.ge.s32.totalorder %s176_s26, 3  }
  0x2f   : >> { %vm269_vm1 = vmand %vm265_vm15, %vm234_vm13  ;;  %s380_s6 = sshrl.u32 (%p173_p11), %s725_s16, 3  ;;  %s553_s10 = sshll.u32 (%p173_p11), %s725_s16, 2 }
  0x30   : > { %s554_s11 = sshll.u32 (%p173_p11), %s380_s6, 7 }
  0x32   : >> { %v181_v6 = vld [vmem:[#allocation2] sm:$0xff]  ;;  %v241_v41 = vld [vmem:[%s239_s28] ss:$0 sm:$0xff] }
  0x33   : >> { %v182_v7 = vand.u32 2147483647, %v181_v6 }
  0x35   : >> { %vm549_vm2 = vcmp.gt.f32.partialorder %v182_v7, -inf }
  0x36   : >> { %vm189_vm4 = vmand %vm187_vm3, %vm549_vm2 }
  0x37   : >> { %v190_v9 = vsel %vm189_vm4, %v767_v2, %v791_v8  ;;  %v191_v10 = vsel %vm189_vm4, %v182_v7, -inf }
  0x38   : >> { %v192_v11 = vrot.slane %v191_v10, 1  ;;  %v193_v12 = vrot.slane %v190_v9, 1 }
  0x3a   : >> { %vm194_vm5 = vcmp.ge.f32.partialorder %v192_v11, %v191_v10  ;;  %v197_v13 = vrot.slane %v192_v11, 1  ;;  %v198_v14 = vrot.slane %v193_v12, 1 }
  0x3b   : >> { %v195_v15 = vsel %vm194_vm5, %v192_v11, %v191_v10  ;;  %v196_v16 = vsel %vm194_vm5, %v193_v12, %v190_v9 }
  0x3c   : >> { %vm199_vm6 = vcmp.ge.f32.partialorder %v197_v13, %v195_v15  ;;  %v202_v17 = vrot.slane %v197_v13, 1  ;;  %v203_v18 = vrot.slane %v198_v14, 1 }
  0x3d   : >> { %v200_v19 = vsel %vm199_vm6, %v197_v13, %v195_v15  ;;  %v201_v20 = vsel %vm199_vm6, %v198_v14, %v196_v16 }
  0x3e   : >> { %vm204_vm7 = vcmp.ge.f32.partialorder %v202_v17, %v200_v19  ;;  %v207_v21 = vrot.slane %v202_v17, 1  ;;  %v208_v22 = vrot.slane %v203_v18, 1 }
  0x3f   : >> { %v205_v23 = vsel %vm204_vm7, %v202_v17, %v200_v19  ;;  %v206_v24 = vsel %vm204_vm7, %v203_v18, %v201_v20 }
  0x40   : >> { %vm209_vm8 = vcmp.ge.f32.partialorder %v207_v21, %v205_v23  ;;  %v212_v25 = vrot.slane %v207_v21, 1  ;;  %v213_v26 = vrot.slane %v208_v22, 1 }
  0x41   : >> { %v210_v27 = vsel %vm209_vm8, %v207_v21, %v205_v23  ;;  %v211_v28 = vsel %vm209_vm8, %v208_v22, %v206_v24 }
  0x42   : >> { %vm214_vm9 = vcmp.ge.f32.partialorder %v212_v25, %v210_v27  ;;  %v217_v29 = vrot.slane %v212_v25, 1  ;;  %v218_v30 = vrot.slane %v213_v26, 1 }
  0x43   : >> { %v215_v31 = vsel %vm214_vm9, %v212_v25, %v210_v27  ;;  %v216_v32 = vsel %vm214_vm9, %v213_v26, %v211_v28 }
  0x44   : >> { %vm219_vm10 = vcmp.ge.f32.partialorder %v217_v29, %v215_v31  ;;  %v222_v33 = vrot.slane %v217_v29, 1  ;;  %v223_v34 = vrot.slane %v218_v30, 1 }
  0x45   : >> { %v220_v35 = vsel %vm219_vm10, %v217_v29, %v215_v31  ;;  %v221_v36 = vsel %vm219_vm10, %v218_v30, %v216_v32 }
  0x46   : >> { %vm224_vm11 = vcmp.ge.f32.partialorder %v222_v33, %v220_v35 }
  0x47   : >> { %v226_v37 = vsel %vm224_vm11, %v223_v34, %v221_v36 }
  0x48   : >> { %228 = vrot.lane.b32.xlu0 %v226_v37, %s227_s27  ;;  %s387_s27 = sshll.u32 (%p173_p11), %s146_s17, 4  ;;  %s388_s27 = int_to_ptr.vmem [resolvable:$true] %s387_s27 }
  0xba   : >> { %v229_v39 = vpop.permute.xlu0 %228 }
  0xbb   : >> { %558 = vpush %v229_v39 }
  0xec   : >> { %s559_s29 = spop %558 }
  0xed   : >> { %v235_v43 = vstv %s559_s29  ;;  %s240_s4 = scalar_lea.vmem [#allocation2], %s559_s29  ;;  %s246_s5 = scalar_lea.vmem [#allocation7], %s559_s29 }
  0xee   : >> { %v242_v44 = vld [vmem:[%s240_s4] ss:$0 sm:$0xff]  ;;  %v237_v46 = vsel %vm234_vm13, %v235_v43, %v236_v40  ;;  %s336_s29 = scalar_lea.sflag (%p173_p11), [#allocation5], %s144_s7 }
  0xef   : >> { %v248_v45 = vld [vmem:[%s246_s5] ss:$0 sm:$0xff]  ;;  %243 = vst [vmem:[%s240_s4] sm:$0x1] %v241_v41  ;;  %vm251_vm14 = vcmp.ne.f32.partialorder %v242_v44, 0.0  ;;  %238 = vst [vmem:[%s775_s19] sm:$0x1] %v237_v46  ;;  %v258_v53 = vsel %vm257_vm12, %v242_v44, 0.0  ;;  %s829_s19 = scalar_lea.hbm (%p173_p11), %s886_s2, %s554_s11 }
  0xf0   : >> { %249 = vst [vmem:[%s246_s5] sm:$0x1] %v247_v42  ;;  %244 = vst [vmem:[%s239_s28] sm:$0x1] %v242_v44  ;;  %s683_s4 = smov (%p173_p11), [#allocation4]  }
  0xf1   : >> { %250 = vst [vmem:[%s245_s30] sm:$0x1] %v248_v45  ;;  %vm252_vm0 = vmand %vm234_vm13, %vm251_vm14  ;;  %s610_s30 = scalar_lea.vmem (%p173_p11), %s388_s27, 128  ;;  %s614_s5 = sshll.u32 (%p173_p11), %s683_s4, 4  ;;  %s615_s5 = int_to_ptr.vmem [resolvable:$false] %s614_s5 }
  0xf2   : >> { %v253_v47 = vsel %vm252_vm0, %v242_v44, 1.0  ;;  %p611_p12 = scmp.ne.s32.totalorder (%p173_p11), %s388_s27, %s610_s30  ;;  %s616_s20 = scalar_lea.vmem (%p173_p11), %s615_s5, 256 }
  0xf3   : >> { %v266_v48 = vsel %vm265_vm15, %v253_v47, 1.0  ;;  %p617_p1 = scmp.lt.s32.totalorder (%p173_p11), %s388_s27, %s615_s5  ;;  %p618_p2 = scmp.lt.s32.totalorder (%p173_p11), %s616_s20, %s610_s30 }
  0xf4   : >> { %608 = vrcp.f32 %v266_v48  ;;  %p612_p13 = pnand (%p173_p11), %p611_p12, %p742_p5 }
  0xf5   : > { %p619_p3 = por (%p173_p11), %p618_p2, %p617_p1 }
  0xf6   : > { %p613_p0 = pneg (%p173_p11), %p612_p13 }
  0xf7   : >> { %v262_v50 = vld [vmem:[#allocation2] sm:$0xff] }
  0xf8   : > { %v276_v57 = vld [vmem:[#allocation7] sm:$0xff] (%p173_p11)  ;;  %p620_p4 = pnand (%p173_p11), %p619_p3, %p613_p0 }
  0xfe   : >> { %v609_v49 = vpop.eup %608 }
  0xff   : >> { %v268_v51 = vmul.f32 %v609_v49, %v262_v50 }
 0x101   : >> { %v270_v52 = vsel %vm269_vm1, %v268_v51, 0.0 }
 0x102   : >> { %271 = vadd.xlane.f32.xlu0 %v270_v52 }
 0x12f   : > { %292 = vxpose.xlu0.b32.start.end [1/1] (short) (narrow) (%p173_p11), %v276_v57, 8 }
 0x18e   : > { %175 = sbr.rel (!%p173_p11) target bundleno = 44 (0x2c), region = 206 }
 0x18f   : >> { %v272_v54 = vpop.xlane.xlu0 %271 }
 0x190   : >> { %v273_v55 = vmul.f32 %v272_v54, %v258_v53 }
 0x192   : >> { %v274_v56 = vsub.f32 %v268_v51, %v273_v55 }
 0x194   : >> { %275 = vst [vmem:[#allocation2] sm:$0xff] %v274_v56 }
 0x19b   : > { %v328_v58 = vld [vmem:[#allocation2] sm:$0xf] }
 0x19c   : > { %330 = vst [vmem:[%s139_s22] sm:$0xf] %v328_v58 }
 0x19d   : > { %623 = shalt.err (!%p620_p4)
}
 0x19e   : > { %s624_s7 = scalar_lea.hbm %s829_s19, 128  ;;  %s628_s26 = scalar_lea.hbm %s886_s2, 128 }
 0x19f   : > { %p625_p7 = scmp.ne.s32.totalorder %s829_s19, %s624_s7  ;;  %p629_p10 = scmp.lt.u32.totalorder %s829_s19, %s886_s2 }
 0x1a0   : > { %p630_p11 = scmp.lt.u32.totalorder %s628_s26, %s624_s7  ;;  %p632_p13 = scmp.lt.u32.totalorder %s624_s7, %s829_s19 }
 0x1a1   : > { %p626_p8 = pnand %p625_p7, %p742_p5 }
 0x1a2   : > { %p631_p12 = por %p630_p11, %p629_p10 }
 0x1a3   : > { %p627_p9 = pneg %p626_p8 }
 0x1a4   : > { %p633_p0 = por %p632_p13, %p631_p12 }
 0x1a6   : > { %p634_p1 = pnand %p633_p0, %p627_p9 }
 0x1a8   : > { %637 = shalt.err (!%p634_p1)
}
 0x1a9   : > { %560 = dma.vmem_to_hbm [thread:$0]  (%p742_p5), %s388_s27, 128, %s829_s19, %s336_s29   ;;  %v361_v59 = vld [vmem:[%s139_s22] sm:$0xf] }
 0x1aa   : > { %s345_s5 = scalar_lea.vmem %s885_s1, %s553_s10  ;;  %393 = sbr.rel (!%p742_p5) target bundleno = 441 (0x1b9), region = 96 }
 0x1ab   : > { %362 = vst [vmem:[%s345_s5] sm:$0xf] %v361_v59  ;;  %s555_s7 = sshll.u32 (%p742_p5), %s380_s6, 3  ;;  %s891_s17 = scalar_lea.vmem (%p742_p5), [#allocation6], %s764_s9 }
 0x1ac   : > { %s396_s29 = scalar_lea.vmem (%p742_p5), %s887_s3, %s555_s7 }
 0x1af   : > { %v308_v60 = vpop.trf.xlu0 }
 0x1b0   : > { %324 = vst [vmem:[%s780_s21] sm:$0x1] %v308_v60 }
 0x1b7   : > { %v424_v61 = vld [vmem:[%s891_s17] sm:$0xff] }
 0x1b8   : > { %425 = vst [vmem:[%s396_s29] sm:$0xff] %v424_v61 }
 0x1b9 PF: > { %p566_p2 = scmp.ge.s32.totalorder %s676_s15, 2  ;;  %s441_s8 = sand.u32 1, %s664_s12  }
 0x1ba   : > { %s442_s24 = scalar_lea.sflag [#allocation5], %s441_s8 }
 0x1bb   : > { %p563_p5 = pnand %p566_p2, %p746_p6 }
 0x1bd   : > { %659 = dma.done.wait (!%p563_p5), %s442_s24, 128  }
 0x1be   : > { %661 = vsyncadd (!%p563_p5), %s442_s24, 4294967168  ;;  %p10_p3 = scmp.ge.s32.totalorder %s729_s18, 10   ;;  %s892_s12 = smov %s668_s13 }
 0x1bf   : > { %s893_s13 = smov %s672_s14  ;;  %s894_s14 = smov %s740_s23 }
 0x1c0   : > { %s895_s15 = smov %s729_s18  ;;  %12 = sbr.rel (!%p10_p3) target bundleno = 3 (0x3), region = 217 }
 0x1c7   :  { %454 = vsyncpa [#allocation5], 1 }
 0x1c8   :  { %456 = vsyncpa [#allocation5 + $0x1], 1 }

// kernel: custom-call.13
= control target key start
LH: loop header
LB: loop body
LE: loop exit
PB: predicated region body
PF: predicated region fallthrough
CT: control target
= control target key end

     0   :  { %s343_s6 = smov 0   ;;  %s345_s7 = smov 0   ;;  %s390_s0 = inlined_call_operand.vmem [shape: f32[8,1,3,3], index: 0, kind: input, shape index: {}]   ;;  %s391_s1 = inlined_call_operand.vmem [shape: f32[8,1,3,3], index: 1, kind: output, shape index: {}]  }
   0x1   :  { %s347_s8 = smov 0  }
   0x2 LB: > { %s269_s9 = sadd.s32 4294967295, %s330_s8   ;;  %s33_s10 = sadd.s32 1, %s326_s7  ;;  %s330_s8 = sphi %s347_s8, %s7_s8   ;;  %s326_s7 = sphi %s345_s7, %s393_s7   ;;  %s322_s6 = sphi %s343_s6, %s392_s6  }
   0x3   : > { %p35_p0 = scmp.ge.s32.totalorder %s33_s10, 8  ;;  %p271_p1 = scmp.ge.s32.totalorder %s330_s8, 8 }
   0x4   : > { %s49_s11 = sand.u32 (!%p271_p1), 1, %s330_s8   ;;  %s273_s12 = sshll.u32 (!%p271_p1), %s326_s7, 2 }
   0x5   : > { %s395_s10 = smov (%p35_p0, %s33_s10), 0  ;;  %47 = sbr.rel (%p271_p1) target bundleno = 12 (0xc), region = 16 }
   0x6   : > { %s272_s13 = sshll.u32 (!%p271_p1), %s49_s11, 2  ;;  %s56_s16 = scalar_lea.vmem (!%p271_p1), %s390_s0, %s273_s12 }
   0x7   : > { %v72_v0 = vld [vmem:[%s56_s16] sm:$0xf] (!%p271_p1)  ;;  %s51_s17 = scalar_lea.vmem (!%p271_p1), [#allocation1], %s272_s13 }
   0x8   : > { %73 = vst [vmem:[%s51_s17] sm:$0xf] (!%p271_p1), %v72_v0 }
   0xc PF: > { %p274_p2 = scmp.ge.s32.totalorder %s330_s8, 1  ;;  %p89_p3 = scmp.lt.s32.totalorder %s330_s8, 9 }
   0xe   : > { %p90_p4 = pnand %p274_p2, %p89_p3 }
  0x10   : > { %93 = sbr.rel (%p90_p4) target bundleno = 511 (0x1ff), region = 50 }
  0x17   : > { %s370_s18 = sand.u32 1, %s269_s9   ;;  %v111_v1 = vlaneseq  ;;  %v332_v11 = vmov -1.0   ;;  %s278_s22 = sshll.u32 %s322_s6, 2 }
  0x18   : > { %s275_s19 = sshll.u32 %s370_s18, 2  ;;  %s178_s25 = scalar_lea.vmem %s391_s1, %s278_s22 }
  0x19   : > { %s102_s20 = scalar_lea.vmem [#allocation1], %s275_s19  ;;  %v112_v3 = vand.u32 127, %v111_v1  ;;  %v115_v4 = vshrl.u32 %v111_v1, 7  ;;  %s106_s21 = scalar_lea.vmem [#allocation3], %s275_s19 }
  0x1a   : > { %v109_v2 = vld [vmem:[%s102_s20] sm:$0xf] }
  0x1b   : > { %110 = vst [vmem:[#allocation0] sm:$0xf] %v109_v2  ;;  %vm113_vm0 = vcmp.lt.s32.totalorder %v112_v3, 3  ;;  %vm122_vm1 = vcmp.ge.s32.totalorder %v115_v4, %v112_v3  ;;  %vm117_vm2 = vcmp.eq.s32.totalorder %v115_v4, %v112_v3  ;;  %vm136_vm4 = vcmp.eq.s32.totalorder %v112_v3, 0 }
  0x1c   : > { %vm123_vm3 = vmand %vm122_vm1, %vm113_vm0  ;;  %vm133_vm5 = vcmp.eq.s32.totalorder %v112_v3, %v115_v4  ;;  %v137_v12 = vsel %vm136_vm4, 1.0, %v332_v11  ;;  %vm144_vm6 = vcmp.eq.s32.totalorder %v112_v3, 1  ;;  %vm154_vm7 = vcmp.eq.s32.totalorder %v112_v3, 2 }
  0x1d   : > { %v138_v13 = vsel %vm133_vm5, %v137_v12, 0.0 }
  0x22   : > { %v118_v5 = vld [vmem:[#allocation0] sm:$0xff] }
  0x23   : > { %v119_v6 = vsel %vm117_vm2, %v118_v5, 0.0  ;;  %v124_v7 = vsel %vm123_vm3, %v118_v5, 0.0 }
  0x24   : > { %120 = vadd.xlane.f32.xlu0 %v119_v6 }
  0xb1   : > { %v121_v8 = vpop.xlane.xlu0 %120 }
  0xb2   : > { %306 = vrcp.f32 %v121_v8  ;;  %vm161_vm8 = vweird.f32 %v121_v8 }
  0xbc   : > { %v307_v9 = vpop.eup %306 }
  0xbd   : > { %v126_v10 = vmul.f32 %v307_v9, %v124_v7 }
  0xbf   : > { %127 = vst [vmem:[#allocation4] sm:$0xff] %v126_v10 }
  0xc6   : > { %v140_v14 = vld [vmem:[#allocation4 + $0x1] ss:$0 sm:$0xff]  ;;  %v150_v17 = vld [vmem:[#allocation4 + $0x2] ss:$0 sm:$0xff] }
  0xc7   : > { %v141_v15 = vxor.u32 2147483648, %v140_v14  ;;  %v151_v19 = vxor.u32 2147483648, %v150_v17 }
  0xc9   : > { %v145_v16 = vmul.f32 %v141_v15, %v138_v13 }
  0xcb   : > { %146 = vadd.xlane.f32.xlu0 %v145_v16 }
 0x158   : > { %v147_v18 = vpop.xlane.xlu0 %146 }
 0x159   : > { %v148_v20 = vsel %vm144_vm6, %v147_v18, %v138_v13 }
 0x15a   : > { %v155_v21 = vmul.f32 %v151_v19, %v148_v20 }
 0x15c   : > { %156 = vadd.xlane.f32.xlu1 %v155_v21 }
 0x1e9   : > { %v157_v22 = vpop.xlane.xlu1 %156 }
 0x1ea   : > { %v158_v23 = vsel %vm154_vm7, %v157_v22, %v148_v20 }
 0x1eb   : > { %v160_v24 = vmul.f32 %v307_v9, %v158_v23 }
 0x1ed   : > { %v162_v25 = vsel %vm161_vm8, %v158_v23, %v160_v24 }
 0x1ee   : > { %163 = vst [vmem:[#allocation2] sm:$0xff] %v162_v25 }
 0x1f5   : > { %v167_v26 = vld [vmem:[#allocation2] sm:$0xf] }
 0x1f6   : > { %169 = vst [vmem:[%s106_s21] sm:$0xf] %v167_v26 }
 0x1fd   : > { %v194_v27 = vld [vmem:[%s106_s21] sm:$0xf] }
 0x1fe   : > { %195 = vst [vmem:[%s178_s25] sm:$0xf] %v194_v27 }
 0x1ff PF: > { %s7_s8 = sadd.s32 1, %s330_s8   ;;  %s392_s6 = smov %s326_s7 }
 0x200   : > { %p4_p5 = scmp.ge.s32.totalorder %s7_s8, 10   ;;  %s393_s7 = smov %s395_s10 }
 0x202   :  { %6 = sbr.rel (!%p4_p5) target bundleno = 2 (0x2), region = 112 }

// kernel: custom-call.12
= control target key start
LH: loop header
LB: loop body
LE: loop exit
PB: predicated region body
PF: predicated region fallthrough
CT: control target
= control target key end

     0   :  { %s342_s6 = smov 0   ;;  %s344_s7 = smov 0   ;;  %s389_s0 = inlined_call_operand.vmem [shape: f32[8,1,3,3], index: 0, kind: input, shape index: {}]   ;;  %s390_s1 = inlined_call_operand.vmem [shape: f32[8,1,3,3], index: 1, kind: output, shape index: {}]  }
   0x1   :  { %s346_s8 = smov 0  }
   0x2 LB: > { %s268_s9 = sadd.s32 4294967295, %s329_s8   ;;  %s33_s10 = sadd.s32 1, %s325_s7  ;;  %s329_s8 = sphi %s346_s8, %s7_s8   ;;  %s325_s7 = sphi %s344_s7, %s392_s7   ;;  %s321_s6 = sphi %s342_s6, %s391_s6  }
   0x3   : > { %p35_p0 = scmp.ge.s32.totalorder %s33_s10, 8  ;;  %p270_p1 = scmp.ge.s32.totalorder %s329_s8, 8 }
   0x4   : > { %s49_s11 = sand.u32 (!%p270_p1), 1, %s329_s8   ;;  %s272_s12 = sshll.u32 (!%p270_p1), %s325_s7, 2 }
   0x5   : > { %s394_s10 = smov (%p35_p0, %s33_s10), 0  ;;  %47 = sbr.rel (%p270_p1) target bundleno = 12 (0xc), region = 16 }
   0x6   : > { %s271_s13 = sshll.u32 (!%p270_p1), %s49_s11, 2  ;;  %s56_s16 = scalar_lea.vmem (!%p270_p1), %s389_s0, %s272_s12 }
   0x7   : > { %v72_v0 = vld [vmem:[%s56_s16] sm:$0xf] (!%p270_p1)  ;;  %s51_s17 = scalar_lea.vmem (!%p270_p1), [#allocation1], %s271_s13 }
   0x8   : > { %73 = vst [vmem:[%s51_s17] sm:$0xf] (!%p270_p1), %v72_v0 }
   0xc PF: > { %p273_p2 = scmp.ge.s32.totalorder %s329_s8, 1  ;;  %p89_p3 = scmp.lt.s32.totalorder %s329_s8, 9 }
   0xe   : > { %p90_p4 = pnand %p273_p2, %p89_p3 }
  0x10   : > { %93 = sbr.rel (%p90_p4) target bundleno = 511 (0x1ff), region = 50 }
  0x17   : > { %s369_s18 = sand.u32 1, %s268_s9   ;;  %v111_v1 = vlaneseq  ;;  %v331_v11 = vmov -1.0   ;;  %s277_s22 = sshll.u32 %s321_s6, 2 }
  0x18   : > { %s274_s19 = sshll.u32 %s369_s18, 2  ;;  %s177_s25 = scalar_lea.vmem %s390_s1, %s277_s22 }
  0x19   : > { %s102_s20 = scalar_lea.vmem [#allocation1], %s274_s19  ;;  %v112_v3 = vand.u32 127, %v111_v1  ;;  %v115_v4 = vshrl.u32 %v111_v1, 7  ;;  %s106_s21 = scalar_lea.vmem [#allocation3], %s274_s19 }
  0x1a   : > { %v109_v2 = vld [vmem:[%s102_s20] sm:$0xf] }
  0x1b   : > { %110 = vst [vmem:[#allocation0] sm:$0xf] %v109_v2  ;;  %vm113_vm0 = vcmp.lt.s32.totalorder %v112_v3, 3  ;;  %vm122_vm1 = vcmp.le.s32.totalorder %v115_v4, %v112_v3  ;;  %vm117_vm2 = vcmp.eq.s32.totalorder %v115_v4, %v112_v3  ;;  %vm136_vm4 = vcmp.eq.s32.totalorder %v112_v3, 2 }
  0x1c   : > { %vm123_vm3 = vmand %vm122_vm1, %vm113_vm0  ;;  %vm133_vm5 = vcmp.eq.s32.totalorder %v112_v3, %v115_v4  ;;  %v137_v12 = vsel %vm136_vm4, 1.0, %v331_v11  ;;  %vm144_vm6 = vcmp.eq.s32.totalorder %v112_v3, 1  ;;  %vm153_vm7 = vcmp.eq.s32.totalorder %v112_v3, 0 }
  0x1d   : > { %v138_v13 = vsel %vm133_vm5, %v137_v12, 0.0 }
  0x22   : > { %v118_v5 = vld [vmem:[#allocation0] sm:$0xff] }
  0x23   : > { %v119_v6 = vsel %vm117_vm2, %v118_v5, 0.0  ;;  %v124_v7 = vsel %vm123_vm3, %v118_v5, 0.0 }
  0x24   : > { %120 = vadd.xlane.f32.xlu0 %v119_v6 }
  0xb1   : > { %v121_v8 = vpop.xlane.xlu0 %120 }
  0xb2   : > { %305 = vrcp.f32 %v121_v8  ;;  %vm160_vm8 = vweird.f32 %v121_v8 }
  0xbc   : > { %v306_v9 = vpop.eup %305 }
  0xbd   : > { %v126_v10 = vmul.f32 %v306_v9, %v124_v7 }
  0xbf   : > { %127 = vst [vmem:[#allocation4] sm:$0xff] %v126_v10 }
  0xc6   : > { %v140_v14 = vld [vmem:[#allocation4 + $0x1] ss:$0 sm:$0xff]  ;;  %v149_v17 = vld [vmem:[#allocation4] ss:$0 sm:$0xff] }
  0xc7   : > { %v141_v15 = vxor.u32 2147483648, %v140_v14  ;;  %v150_v19 = vxor.u32 2147483648, %v149_v17 }
  0xc9   : > { %v145_v16 = vmul.f32 %v141_v15, %v138_v13 }
  0xcb   : > { %146 = vadd.xlane.f32.xlu0 %v145_v16 }
 0x158   : > { %v147_v18 = vpop.xlane.xlu0 %146 }
 0x159   : > { %v148_v20 = vsel %vm144_vm6, %v147_v18, %v138_v13 }
 0x15a   : > { %v154_v21 = vmul.f32 %v150_v19, %v148_v20 }
 0x15c   : > { %155 = vadd.xlane.f32.xlu1 %v154_v21 }
 0x1e9   : > { %v156_v22 = vpop.xlane.xlu1 %155 }
 0x1ea   : > { %v157_v23 = vsel %vm153_vm7, %v156_v22, %v148_v20 }
 0x1eb   : > { %v159_v24 = vmul.f32 %v306_v9, %v157_v23 }
 0x1ed   : > { %v161_v25 = vsel %vm160_vm8, %v157_v23, %v159_v24 }
 0x1ee   : > { %162 = vst [vmem:[#allocation2] sm:$0xff] %v161_v25 }
 0x1f5   : > { %v166_v26 = vld [vmem:[#allocation2] sm:$0xf] }
 0x1f6   : > { %168 = vst [vmem:[%s106_s21] sm:$0xf] %v166_v26 }
 0x1fd   : > { %v193_v27 = vld [vmem:[%s106_s21] sm:$0xf] }
 0x1fe   : > { %194 = vst [vmem:[%s177_s25] sm:$0xf] %v193_v27 }
 0x1ff PF: > { %s7_s8 = sadd.s32 1, %s329_s8   ;;  %s391_s6 = smov %s325_s7 }
 0x200   : > { %p4_p5 = scmp.ge.s32.totalorder %s7_s8, 10   ;;  %s392_s7 = smov %s394_s10 }
 0x202   :  { %6 = sbr.rel (!%p4_p5) target bundleno = 2 (0x2), region = 111 }

// kernel: rotation_attention_forward.1
= control target key start
LH: loop header
LB: loop body
LE: loop exit
PB: predicated region body
PF: predicated region fallthrough
CT: control target
= control target key end

     0   :  { %s2165_s30 = smov 0   ;;  %s2575_s0 = inlined_call_operand.vmem [shape: f32[256,128], index: 0, kind: input, shape index: {}]   ;;  %s2576_s1 = inlined_call_operand.vmem [shape: f32[64,128], index: 1, kind: input, shape index: {}]   ;;  %s2577_s2 = inlined_call_operand.vmem [shape: f32[64,6], index: 2, kind: input, shape index: {}]   ;;  %s2578_s3 = inlined_call_operand.vmem [shape: f32[6,128], index: 3, kind: input, shape index: {}]   ;;  %s2579_s4 = inlined_call_operand.vmem [shape: f32[1,128], index: 4, kind: input, shape index: {}]   ;;  %s2580_s5 = inlined_call_operand.vmem [shape: f32[128,128], index: 5, kind: input, shape index: {}]   ;;  %s2581_s6 = inlined_call_operand.vmem [shape: f32[1,128], index: 6, kind: input, shape index: {}]   ;;  %s2582_s7 = inlined_call_operand.vmem [shape: f32[128,128], index: 7, kind: input, shape index: {}]   ;;  %s2583_s8 = inlined_call_operand.vmem [shape: f32[1,128], index: 8, kind: input, shape index: {}]   ;;  %s2584_s9 = inlined_call_operand.vmem [shape: f32[256,128], index: 9, kind: output, shape index: {}]  }
   0x1 LB: > { %s1529_s10 = sadd.s32 4294967295, %s2113_s30   ;;  %p1533_p0 = scmp.ge.s32.totalorder %s2113_s30, 1  ;;  %s2113_s30 = sphi %s2165_s30, %s19_s30  }
   0x2   : > { %p288_p1 = scmp.lt.s32.totalorder %s2113_s30, 3 }
   0x4   : > { %p289_p2 = pnand %p1533_p0, %p288_p1 }
   0x5   : > { %v352_v0 = vld [vmem:[%s2576_s1] sm:$0xff] (!%p289_p2)  ;;  %v353_v1 = vld [vmem:[%s2576_s1 + $0x8] sm:$0xff] (!%p289_p2)  ;;  %v354_v2 = vld [vmem:[%s2576_s1 + $0x10] sm:$0xff] (!%p289_p2)  ;;  %s1534_s17 = sshll.u32 (!%p289_p2), %s1529_s10, 4  ;;  %vm521_vm0 = vcmask (!%p289_p2), 523264   ;;  %vm956_vm1 = vcmask (!%p289_p2), 1045504  }
   0x6   : > { %292 = sbr.rel (%p289_p2) target bundleno = 1465 (0x5b9), region = 56  ;;  %v1923_v3 = vpack.c.bf16 (!%p289_p2), %v353_v1, %v352_v0  ;;  %v355_v4 = vld [vmem:[%s2576_s1 + $0x18] sm:$0xff] (!%p289_p2)  ;;  %p325_p3 = scmp.lt.s32.totalorder (!%p289_p2), %s1534_s17, 31  ;;  %v356_v6 = vld [vmem:[%s2576_s1 + $0x20] sm:$0xff] (!%p289_p2)  ;;  %v357_v7 = vld [vmem:[%s2576_s1 + $0x28] sm:$0xff] (!%p289_p2)  ;;  %vm907_vm2 = vcmask (!%p289_p2), 48128  }
   0x7   : > { %v1927_v5 = vpack.c.bf16 (!%p289_p2), %v355_v4, %v354_v2  ;;  %v1931_v9 = vpack.c.bf16 (!%p289_p2), %v357_v7, %v356_v6  ;;  %v358_v10 = vld [vmem:[%s2576_s1 + $0x30] sm:$0xff] (!%p289_p2)  ;;  %v359_v11 = vld [vmem:[%s2576_s1 + $0x38] sm:$0xff] (!%p289_p2) }
   0x8   : > { %1924 = vmatprep.subr.bf16.mxu0 (!%p289_p2), %v1923_v3  ;;  %v1935_v12 = vpack.c.bf16 (!%p289_p2), %v359_v11, %v358_v10 }
   0x9   : > { %1926 = vmatpush3.bf16.xpose.msra.mxu0 (!%p289_p2), %v1923_v3 }
   0xa   : > { %1928 = vmatprep.subr.bf16.mxu0 (!%p289_p2), %v1927_v5 }
   0xd   : > { %s2586_s17 = smov (!%p325_p3, %s1534_s17), 31 }
   0xe   : > { %s1535_s20 = sshll.u32 %s2586_s17, 3 }
   0xf   : > { %s2199_s27 = scalar_lea.vmem %s2575_s0, %s1535_s20  ;;  %s2554_s12 = scalar_lea.vmem %s2584_s9, %s1535_s20 }
  0x10   : > { %v336_v8 = vld [vmem:[%s2199_s27] sm:$0xff]  ;;  %v337_v13 = vld [vmem:[%s2199_s27 + $0x8] sm:$0xff]  ;;  %v338_v14 = vld [vmem:[%s2199_s27 + $0x10] sm:$0xff] }
  0x11   : > { %1721 = vmatprep.mubr.f32.mxu0 %v336_v8  ;;  %1930 = vmatpush3.bf16.xpose.msra.mxu0 %v1927_v5  ;;  %v339_v15 = vld [vmem:[%s2199_s27 + $0x18] sm:$0xff]  ;;  %v340_v16 = vld [vmem:[%s2199_s27 + $0x20] sm:$0xff]  ;;  %v341_v17 = vld [vmem:[%s2199_s27 + $0x28] sm:$0xff] }
  0x12   : > { %1932 = vmatprep.subr.bf16.mxu0 %v1931_v9  ;;  %v342_v18 = vld [vmem:[%s2199_s27 + $0x30] sm:$0xff]  ;;  %v343_v19 = vld [vmem:[%s2199_s27 + $0x38] sm:$0xff]  ;;  %v344_v20 = vld [vmem:[%s2199_s27 + $0x40] sm:$0xff] }
  0x13   : > { %v345_v21 = vld [vmem:[%s2199_s27 + $0x48] sm:$0xff]  ;;  %v346_v22 = vld [vmem:[%s2199_s27 + $0x50] sm:$0xff]  ;;  %v347_v23 = vld [vmem:[%s2199_s27 + $0x58] sm:$0xff] }
  0x14   : > { %v348_v24 = vld [vmem:[%s2199_s27 + $0x60] sm:$0xff]  ;;  %v349_v25 = vld [vmem:[%s2199_s27 + $0x68] sm:$0xff]  ;;  %v350_v26 = vld [vmem:[%s2199_s27 + $0x70] sm:$0xff] }
  0x15   : > { %v351_v27 = vld [vmem:[%s2199_s27 + $0x78] sm:$0xff] }
  0x19   : > { %1934 = vmatpush3.bf16.xpose.msra.mxu0 %v1931_v9 }
  0x1a   : > { %1936 = vmatprep.subr.bf16.mxu0 %v1935_v12 }
  0x21   : > { %1938 = vmatpush3.bf16.xpose.msra.mxu0 %v1935_v12 }
  0x28   : > { %1722 = vmatmul.mubr.f32.vlgmr.msra.gmra.mrb[0].mxu0 %v337_v13 }
  0x29   : > { %1724 = vmatprep.mubr.f32.mxu0 %v338_v14 }
  0x2c   : > { %1725 = vmatmul.mubr.f32.gmra.mrb[2].mxu0 %v339_v15 }
  0x2d   : > { %1727 = vmatprep.mubr.f32.mxu0 %v340_v16 }
  0x30   : > { %1728 = vmatmul.mubr.f32.gmra.mrb[4].mxu0 %v341_v17 }
  0x31   : > { %1730 = vmatprep.mubr.f32.mxu0 %v342_v18 }
  0x34   : > { %1731 = vmatmul.mubr.f32.gmra.mrb[6].mxu0 %v343_v19 }
  0x35   : > { %1733 = vmatprep.mubr.f32.mxu0 %v344_v20 }
  0x38   : > { %1734 = vmatmul.mubr.f32.gmra.mrb[8].mxu0 %v345_v21 }
  0x39   : > { %1736 = vmatprep.mubr.f32.mxu0 %v346_v22 }
  0x3c   : > { %1737 = vmatmul.mubr.f32.gmra.mrb[10].mxu0 %v347_v23 }
  0x3d   : > { %1739 = vmatprep.mubr.f32.mxu0 %v348_v24 }
  0x40   : > { %1740 = vmatmul.mubr.f32.gmra.mrb[12].mxu0 %v349_v25 }
  0x41   : > { %1742 = vmatprep.mubr.f32.mxu0 %v350_v26 }
  0x44   : > { %1743 = vmatmul.mubr.f32.gmra.mrb[14].mxu0 %v351_v27 }
  0xfb   : > { %v1723_v28 = vpop.f32.mrb[0].mxu0 }
  0xfc   : > { %v426_v29 = vpop.f32.mrb[1].mxu0  ;;  %v2225_v31 = vmul.f32 10.0, %v1723_v28 }
  0xfd   : > { %v2223_v30 = vmul.f32 10.0, %v426_v29 }
  0xfe   : > { %v525_v38 = vsel %vm521_vm0, %v2225_v31, -inf }
  0xff   : > { %v1726_v32 = vpop.f32.mrb[2].mxu0  ;;  %v522_v33 = vsel %vm521_vm0, %v2223_v30, -inf }
 0x100   : > { %523 = vmax.xlane.f32.xlu0 %v522_v33  ;;  %v436_v34 = vpop.f32.mrb[3].mxu0  ;;  %v2231_v36 = vmul.f32 10.0, %v1726_v32 }
 0x101   : > { %v2229_v35 = vmul.f32 10.0, %v436_v34 }
 0x102   : > { %v531_v44 = vsel %vm521_vm0, %v2231_v36, -inf }
 0x103   : > { %v1729_v37 = vpop.f32.mrb[4].mxu0  ;;  %v528_v39 = vsel %vm521_vm0, %v2229_v35, -inf }
 0x104   : > { %526 = vmax.xlane.f32.xlu0 %v525_v38  ;;  %529 = vmax.xlane.f32.xlu1 %v528_v39  ;;  %v446_v40 = vpop.f32.mrb[5].mxu0  ;;  %v2239_v42 = vmul.f32 10.0, %v1729_v37 }
 0x105   : > { %v2237_v41 = vmul.f32 10.0, %v446_v40 }
 0x106   : > { %v537_v50 = vsel %vm521_vm0, %v2239_v42, -inf }
 0x107   : > { %v1732_v43 = vpop.f32.mrb[6].mxu0  ;;  %v534_v45 = vsel %vm521_vm0, %v2237_v41, -inf }
 0x108   : > { %532 = vmax.xlane.f32.xlu1 %v531_v44  ;;  %535 = vmax.xlane.f32.xlu0 %v534_v45  ;;  %v456_v46 = vpop.f32.mrb[7].mxu0  ;;  %v2247_v48 = vmul.f32 10.0, %v1732_v43 }
 0x109   : > { %v2245_v47 = vmul.f32 10.0, %v456_v46 }
 0x10a   : > { %v543_v56 = vsel %vm521_vm0, %v2247_v48, -inf }
 0x10b   : > { %v1735_v49 = vpop.f32.mrb[8].mxu0  ;;  %v540_v51 = vsel %vm521_vm0, %v2245_v47, -inf }
 0x10c   : > { %538 = vmax.xlane.f32.xlu1 %v537_v50  ;;  %541 = vmax.xlane.f32.xlu0 %v540_v51  ;;  %v466_v52 = vpop.f32.mrb[9].mxu0  ;;  %v2255_v54 = vmul.f32 10.0, %v1735_v49 }
 0x10d   : > { %v2253_v53 = vmul.f32 10.0, %v466_v52 }
 0x10e   : > { %v549_v62 = vsel %vm521_vm0, %v2255_v54, -inf }
 0x10f   : > { %v1738_v55 = vpop.f32.mrb[10].mxu0  ;;  %v546_v57 = vsel %vm521_vm0, %v2253_v53, -inf }
 0x110   : > { %544 = vmax.xlane.f32.xlu1 %v543_v56  ;;  %547 = vmax.xlane.f32.xlu0 %v546_v57  ;;  %v476_v58 = vpop.f32.mrb[11].mxu0  ;;  %v2263_v60 = vmul.f32 10.0, %v1738_v55 }
 0x111   : > { %v2261_v59 = vmul.f32 10.0, %v476_v58 }
 0x112   : > { %v555_v4 = vsel %vm521_vm0, %v2263_v60, -inf }
 0x113   : > { %v1741_v61 = vpop.f32.mrb[12].mxu0  ;;  %v552_v63 = vsel %vm521_vm0, %v2261_v59, -inf }
 0x114   : > { %550 = vmax.xlane.f32.xlu1 %v549_v62  ;;  %553 = vmax.xlane.f32.xlu0 %v552_v63  ;;  %v486_v0 = vpop.f32.mrb[13].mxu0  ;;  %v2271_v2 = vmul.f32 10.0, %v1741_v61 }
 0x115   : > { %v2269_v1 = vmul.f32 10.0, %v486_v0 }
 0x116   : > { %v561_v9 = vsel %vm521_vm0, %v2271_v2, -inf }
 0x117   : > { %v1744_v3 = vpop.f32.mrb[14].mxu0  ;;  %v558_v5 = vsel %vm521_vm0, %v2269_v1, -inf }
 0x118   : > { %556 = vmax.xlane.f32.xlu1 %v555_v4  ;;  %559 = vmax.xlane.f32.xlu0 %v558_v5  ;;  %v496_v6 = vpop.f32.mrb[15].mxu0  ;;  %v2279_v8 = vmul.f32 10.0, %v1744_v3 }
 0x119   : > { %v2277_v7 = vmul.f32 10.0, %v496_v6  ;;  %v698_v6 = vld [vmem:[%s2577_s2] sm:$0xff] }
 0x11a   : > { %v567_v11 = vsel %vm521_vm0, %v2279_v8, -inf }
 0x11b   : > { %v564_v10 = vsel %vm521_vm0, %v2277_v7, -inf }
 0x11c   : > { %562 = vmax.xlane.f32.xlu1 %v561_v9  ;;  %565 = vmax.xlane.f32.xlu0 %v564_v10  ;;  %v699_v9 = vld [vmem:[%s2577_s2 + $0x8] sm:$0xff] }
 0x120   : > { %568 = vmax.xlane.f32.xlu1 %v567_v11 }
 0x18d   : > { %v524_v12 = vpop.xlane.xlu0 %523 }
 0x18e   : > { %v570_v13 = vsub.f32 %v2223_v30, %v524_v12  ;;  %v1939_v12 = vpack.c.bf16 %v699_v9, %v698_v6 }
 0x190   : > { %v586_v14 = vmul.f32 1.442695, %v570_v13  ;;  %1940 = vmatprep.subr.bf16.mxu1 %v1939_v12 }
 0x191   : > { %v527_v15 = vpop.xlane.xlu0 %526  ;;  %v530_v16 = vpop.xlane.xlu1 %529  ;;  %1942 = vmatpush3.bf16.msra.mxu1 %v1939_v12 }
 0x192   : > { %2043 = vpow2.f32 %v586_v14  ;;  %v571_v17 = vsub.f32 %v2225_v31, %v527_v15  ;;  %v572_v18 = vsub.f32 %v2229_v35, %v530_v16 }
 0x194   : > { %v588_v19 = vmul.f32 1.442695, %v571_v17  ;;  %v590_v20 = vmul.f32 1.442695, %v572_v18  ;;  %v700_v17 = vld [vmem:[%s2577_s2 + $0x10] sm:$0xff]  ;;  %v701_v18 = vld [vmem:[%s2577_s2 + $0x18] sm:$0xff] }
 0x195   : > { %v533_v21 = vpop.xlane.xlu1 %532  ;;  %v536_v22 = vpop.xlane.xlu0 %535 }
 0x196   : > { %2045 = vpow2.f32 %v588_v19  ;;  %v573_v23 = vsub.f32 %v2231_v36, %v533_v21  ;;  %v574_v24 = vsub.f32 %v2237_v41, %v536_v22 }
 0x197   : > { %2047 = vpow2.f32 %v590_v20 }
 0x198   : > { %v592_v25 = vmul.f32 1.442695, %v573_v23  ;;  %v594_v26 = vmul.f32 1.442695, %v574_v24  ;;  %v702_v24 = vld [vmem:[%s2577_s2 + $0x20] sm:$0xff] }
 0x199   : > { %v539_v27 = vpop.xlane.xlu1 %538  ;;  %v542_v28 = vpop.xlane.xlu0 %541 }
 0x19a   : > { %2049 = vpow2.f32 %v592_v25  ;;  %v575_v29 = vsub.f32 %v2239_v42, %v539_v27  ;;  %v576_v30 = vsub.f32 %v2245_v47, %v542_v28  ;;  %v703_v25 = vld [vmem:[%s2577_s2 + $0x28] sm:$0xff] }
 0x19b   : > { %2051 = vpow2.f32 %v594_v26  ;;  %v1947_v27 = vpack.c.bf16 %v703_v25, %v702_v24  ;;  %v1105_v25 = vld [vmem:[%s2580_s5] sm:$0xff] }
 0x19c   : > { %v2294_v31 = vpop.eup %2043  ;;  %v596_v32 = vmul.f32 1.442695, %v575_v29  ;;  %v598_v33 = vmul.f32 1.442695, %v576_v30 }
 0x19d   : > { %v545_v34 = vpop.xlane.xlu1 %544  ;;  %v548_v35 = vpop.xlane.xlu0 %547  ;;  %v618_v36 = vsel %vm521_vm0, %v2294_v31, 0.0 }
 0x19e   : > { %2053 = vpow2.f32 %v596_v32  ;;  %v577_v37 = vsub.f32 %v2247_v48, %v545_v34  ;;  %v578_v38 = vsub.f32 %v2253_v53, %v548_v35  ;;  %619 = vadd.xlane.f32.xlu0 %v618_v36  ;;  %v704_v32 = vld [vmem:[%s2577_s2 + $0x30] sm:$0xff] }
 0x19f   : > { %2055 = vpow2.f32 %v598_v33  ;;  %v705_v33 = vld [vmem:[%s2577_s2 + $0x38] sm:$0xff] }
 0x1a0   : > { %v2300_v39 = vpop.eup %2045  ;;  %v600_v40 = vmul.f32 1.442695, %v577_v37  ;;  %v602_v41 = vmul.f32 1.442695, %v578_v38  ;;  %v1951_v35 = vpack.c.bf16 %v705_v33, %v704_v32  ;;  %v1109_v32 = vld [vmem:[%s2580_s5 + $0x20] sm:$0xff]  ;;  %v1110_v33 = vld [vmem:[%s2580_s5 + $0x28] sm:$0xff] }
 0x1a1   : > { %v2302_v42 = vpop.eup %2047  ;;  %v551_v43 = vpop.xlane.xlu1 %550  ;;  %v621_v45 = vsel %vm521_vm0, %v2300_v39, 0.0 }
 0x1a2   : > { %v554_v44 = vpop.xlane.xlu0 %553  ;;  %2057 = vpow2.f32 %v600_v40  ;;  %v579_v46 = vsub.f32 %v2255_v54, %v551_v43  ;;  %622 = vadd.xlane.f32.xlu1 %v621_v45  ;;  %v624_v48 = vsel %vm521_vm0, %v2302_v42, 0.0  ;;  %v899_v43 = vld [vmem:[%s2578_s3] sm:$0x3f] }
 0x1a3   : > { %v580_v47 = vsub.f32 %v2261_v59, %v554_v44  ;;  %2059 = vpow2.f32 %v602_v41  ;;  %625 = vadd.xlane.f32.xlu0 %v624_v48 }
 0x1a4   : > { %v2310_v49 = vpop.eup %2049  ;;  %v604_v50 = vmul.f32 1.442695, %v579_v46 }
 0x1a5   : > { %v606_v51 = vmul.f32 1.442695, %v580_v47  ;;  %v2312_v52 = vpop.eup %2051  ;;  %v557_v53 = vpop.xlane.xlu1 %556  ;;  %v627_v56 = vsel %vm521_vm0, %v2310_v49, 0.0 }
 0x1a6   : > { %v560_v55 = vpop.xlane.xlu0 %559  ;;  %2061 = vpow2.f32 %v604_v50  ;;  %v581_v54 = vsub.f32 %v2263_v60, %v557_v53  ;;  %628 = vadd.xlane.f32.xlu1 %v627_v56  ;;  %v630_v58 = vsel %vm521_vm0, %v2312_v52, 0.0 }
 0x1a7   : > { %v582_v57 = vsub.f32 %v2269_v1, %v560_v55  ;;  %2063 = vpow2.f32 %v606_v51  ;;  %631 = vadd.xlane.f32.xlu0 %v630_v58 }
 0x1a8   : > { %v2320_v59 = vpop.eup %2053  ;;  %v608_v61 = vmul.f32 1.442695, %v581_v54 }
 0x1a9   : > { %v610_v62 = vmul.f32 1.442695, %v582_v57  ;;  %v2322_v63 = vpop.eup %2055  ;;  %v563_v0 = vpop.xlane.xlu1 %562  ;;  %v633_v4 = vsel %vm521_vm0, %v2320_v59, 0.0 }
 0x1aa   : > { %v566_v3 = vpop.xlane.xlu0 %565  ;;  %2065 = vpow2.f32 %v608_v61  ;;  %v583_v60 = vsub.f32 %v2271_v2, %v563_v0  ;;  %634 = vadd.xlane.f32.xlu1 %v633_v4  ;;  %v636_v5 = vsel %vm521_vm0, %v2322_v63, 0.0 }
 0x1ab   : > { %v584_v1 = vsub.f32 %v2277_v7, %v566_v3  ;;  %2067 = vpow2.f32 %v610_v62  ;;  %637 = vadd.xlane.f32.xlu0 %v636_v5 }
 0x1ac   : > { %v2336_v10 = vpop.eup %2057  ;;  %v612_v11 = vmul.f32 1.442695, %v583_v60 }
 0x1ad   : > { %v614_v2 = vmul.f32 1.442695, %v584_v1  ;;  %v2338_v7 = vpop.eup %2059  ;;  %v569_v13 = vpop.xlane.xlu1 %568  ;;  %v639_v14 = vsel %vm521_vm0, %v2336_v10, 0.0 }
 0x1ae   : > { %2069 = vpow2.f32 %v612_v11  ;;  %v585_v15 = vsub.f32 %v2279_v8, %v569_v13  ;;  %640 = vadd.xlane.f32.xlu1 %v639_v14  ;;  %v642_v16 = vsel %vm521_vm0, %v2338_v7, 0.0  ;;  %v1943_v8 = vpack.c.bf16 %v701_v18, %v700_v17 }
 0x1af   : > { %2071 = vpow2.f32 %v614_v2  ;;  %643 = vadd.xlane.f32.xlu0 %v642_v16 }
 0x1b0   : > { %v2351_v19 = vpop.eup %2061  ;;  %v616_v20 = vmul.f32 1.442695, %v585_v15  ;;  %1944 = vmatprep.subr.bf16.mxu1 %v1943_v8 }
 0x1b1   : > { %v2353_v21 = vpop.eup %2063  ;;  %v645_v22 = vsel %vm521_vm0, %v2351_v19, 0.0  ;;  %1946 = vmatpush3.bf16.msra.mxu1 %v1943_v8 }
 0x1b2   : > { %2073 = vpow2.f32 %v616_v20  ;;  %646 = vadd.xlane.f32.xlu1 %v645_v22  ;;  %v648_v23 = vsel %vm521_vm0, %v2353_v21, 0.0  ;;  %1948 = vmatprep.subr.bf16.mxu1 %v1947_v27 }
 0x1b3   : > { %649 = vadd.xlane.f32.xlu0 %v648_v23 }
 0x1b4   : > { %v2365_v26 = vpop.eup %2065 }
 0x1b5   : > { %v2367_v28 = vpop.eup %2067  ;;  %v651_v29 = vsel %vm521_vm0, %v2365_v26, 0.0  ;;  %1950 = vmatpush3.bf16.msra.mxu1 %v1947_v27  ;;  %v1107_v27 = vld [vmem:[%s2580_s5 + $0x10] sm:$0xff] }
 0x1b6   : > { %652 = vadd.xlane.f32.xlu1 %v651_v29  ;;  %v654_v30 = vsel %vm521_vm0, %v2367_v28, 0.0  ;;  %1952 = vmatprep.subr.bf16.mxu1 %v1951_v35  ;;  %v1108_v29 = vld [vmem:[%s2580_s5 + $0x18] sm:$0xff] }
 0x1b7   : > { %655 = vadd.xlane.f32.xlu0 %v654_v30  ;;  %v1959_v30 = vpack.c.bf16 %v1108_v29, %v1107_v27 }
 0x1b8   : > { %v2379_v34 = vpop.eup %2069 }
 0x1b9   : > { %v2381_v36 = vpop.eup %2071  ;;  %v657_v37 = vsel %vm521_vm0, %v2379_v34, 0.0  ;;  %1954 = vmatpush3.bf16.msra.mxu1 %v1951_v35  ;;  %v1111_v35 = vld [vmem:[%s2580_s5 + $0x30] sm:$0xff] }
 0x1ba   : > { %658 = vadd.xlane.f32.xlu1 %v657_v37  ;;  %v660_v38 = vsel %vm521_vm0, %v2381_v36, 0.0  ;;  %1785 = vmatprep.subr.msk.mxu1 %vm956_vm1, %v899_v43 }
 0x1bb   : > { %661 = vadd.xlane.f32.xlu0 %v660_v38  ;;  %v1113_v38 = vld [vmem:[%s2580_s5 + $0x40] sm:$0xff] }
 0x1bc   : > { %v2387_v40 = vpop.eup %2073 }
 0x1bd   : > { %v663_v41 = vsel %vm521_vm0, %v2387_v40, 0.0 }
 0x1be   : > { %664 = vadd.xlane.f32.xlu1 %v663_v41 }
 0x22b   : > { %v620_v44 = vpop.xlane.xlu0 %619 }
 0x22c   : > { %2075 = vrcp.f32 %v620_v44  ;;  %v1116_v44 = vld [vmem:[%s2580_s5 + $0x58] sm:$0xff] }
 0x22f   : > { %v623_v45 = vpop.xlane.xlu1 %622 }
 0x230   : > { %2077 = vrcp.f32 %v623_v45  ;;  %v626_v46 = vpop.xlane.xlu0 %625 }
 0x231   : > { %2079 = vrcp.f32 %v626_v46  ;;  %v1117_v46 = vld [vmem:[%s2580_s5 + $0x60] sm:$0xff] }
 0x233   : > { %v629_v47 = vpop.xlane.xlu1 %628 }
 0x234   : > { %2081 = vrcp.f32 %v629_v47  ;;  %v632_v48 = vpop.xlane.xlu0 %631  ;;  %v1118_v47 = vld [vmem:[%s2580_s5 + $0x68] sm:$0xff] }
 0x235   : > { %2083 = vrcp.f32 %v632_v48  ;;  %v1979_v48 = vpack.c.bf16 %v1118_v47, %v1117_v46 }
 0x236   : > { %v2076_v50 = vpop.eup %2075 }
 0x237   : > { %v635_v51 = vpop.xlane.xlu1 %634  ;;  %v682_v53 = vmul.f32 %v2076_v50, %v2294_v31 }
 0x238   : > { %2085 = vrcp.f32 %v635_v51  ;;  %v638_v55 = vpop.xlane.xlu0 %637 }
 0x239   : > { %2087 = vrcp.f32 %v638_v55  ;;  %1761 = vmatprep.mubr.msk.f32.mxu1 %vm521_vm0, %v682_v53 }
 0x23a   : > { %v2078_v56 = vpop.eup %2077 }
 0x23b   : > { %v2080_v54 = vpop.eup %2079  ;;  %v641_v57 = vpop.xlane.xlu1 %640  ;;  %v683_v58 = vmul.f32 %v2078_v56, %v2300_v39 }
 0x23c   : > { %2089 = vrcp.f32 %v641_v57  ;;  %v644_v61 = vpop.xlane.xlu0 %643  ;;  %v684_v62 = vmul.f32 %v2080_v54, %v2302_v42 }
 0x23d   : > { %2091 = vrcp.f32 %v644_v61  ;;  %1762 = vmatmul.mubr.msk.f32.vlgmr.msra.gmra.mrb[0].mxu1 %vm521_vm0, %v683_v58 }
 0x23e   : > { %v2082_v0 = vpop.eup %2081  ;;  %1764 = vmatprep.mubr.msk.f32.mxu1 %vm521_vm0, %v684_v62  ;;  %1786 = vmatpush3.msk.msra.mxu1 %vm956_vm1, %v899_v43  ;;  %v1115_v43 = vld [vmem:[%s2580_s5 + $0x50] sm:$0xff] }
 0x23f   : > { %v2084_v31 = vpop.eup %2083  ;;  %v647_v3 = vpop.xlane.xlu1 %646  ;;  %v685_v4 = vmul.f32 %v2082_v0, %v2310_v49  ;;  %v1975_v45 = vpack.c.bf16 %v1116_v44, %v1115_v43 }
 0x240   : > { %2093 = vrcp.f32 %v647_v3  ;;  %v650_v60 = vpop.xlane.xlu0 %649  ;;  %v686_v39 = vmul.f32 %v2084_v31, %v2312_v52 }
 0x241   : > { %2095 = vrcp.f32 %v650_v60  ;;  %1765 = vmatmul.mubr.msk.f32.gmra.mrb[2].mxu1 %vm521_vm0, %v685_v4 }
 0x242   : > { %v2086_v42 = vpop.eup %2085  ;;  %1767 = vmatprep.mubr.msk.f32.mxu1 %vm521_vm0, %v686_v39 }
 0x243   : > { %v2088_v1 = vpop.eup %2087  ;;  %v653_v5 = vpop.xlane.xlu1 %652  ;;  %v687_v6 = vmul.f32 %v2086_v42, %v2320_v59  ;;  %v1119_v42 = vld [vmem:[%s2580_s5 + $0x70] sm:$0xff] }
 0x244   : > { %2097 = vrcp.f32 %v653_v5  ;;  %v656_v9 = vpop.xlane.xlu0 %655  ;;  %v688_v11 = vmul.f32 %v2088_v1, %v2322_v63  ;;  %v1120_v1 = vld [vmem:[%s2580_s5 + $0x78] sm:$0xff] }
 0x245   : > { %2099 = vrcp.f32 %v656_v9  ;;  %1768 = vmatmul.mubr.msk.f32.gmra.mrb[4].mxu1 %vm521_vm0, %v687_v6  ;;  %v1983_v5 = vpack.c.bf16 %v1120_v1, %v1119_v42  ;;  %v1289_v6 = vld [vmem:[%s2582_s7] sm:$0xff]  ;;  %v1290_v9 = vld [vmem:[%s2582_s7 + $0x8] sm:$0xff] }
 0x246   : > { %v2090_v49 = vpop.eup %2089  ;;  %1770 = vmatprep.mubr.msk.f32.mxu1 %vm521_vm0, %v688_v11  ;;  %v1291_v11 = vld [vmem:[%s2582_s7 + $0x10] sm:$0xff] }
 0x247   : > { %v2092_v52 = vpop.eup %2091  ;;  %v659_v2 = vpop.xlane.xlu1 %658  ;;  %v689_v12 = vmul.f32 %v2090_v49, %v2336_v10  ;;  %v1987_v49 = vpack.c.bf16 %v1290_v9, %v1289_v6 }
 0x248   : > { %2101 = vrcp.f32 %v659_v2  ;;  %v662_v13 = vpop.xlane.xlu0 %661  ;;  %v690_v14 = vmul.f32 %v2092_v52, %v2338_v7  ;;  %v1292_v52 = vld [vmem:[%s2582_s7 + $0x18] sm:$0xff] }
 0x249   : > { %2103 = vrcp.f32 %v662_v13  ;;  %1771 = vmatmul.mubr.msk.f32.gmra.mrb[6].mxu1 %vm521_vm0, %v689_v12  ;;  %v1991_v2 = vpack.c.bf16 %v1292_v52, %v1291_v11  ;;  %2019 = vmatprep.subr.bf16.mxu1 %v1987_v49  ;;  %v1293_v12 = vld [vmem:[%s2582_s7 + $0x20] sm:$0xff]  ;;  %v1294_v13 = vld [vmem:[%s2582_s7 + $0x28] sm:$0xff] }
 0x24a   : > { %v2094_v59 = vpop.eup %2093  ;;  %1773 = vmatprep.mubr.msk.f32.mxu1 %vm521_vm0, %v690_v14  ;;  %v1995_v14 = vpack.c.bf16 %v1294_v13, %v1293_v12 }
 0x24b   : > { %v2096_v63 = vpop.eup %2095  ;;  %v665_v15 = vpop.xlane.xlu1 %664  ;;  %v691_v16 = vmul.f32 %v2094_v59, %v2351_v19  ;;  %v1295_v59 = vld [vmem:[%s2582_s7 + $0x30] sm:$0xff] }
 0x24c   : > { %2105 = vrcp.f32 %v665_v15  ;;  %v692_v17 = vmul.f32 %v2096_v63, %v2353_v21  ;;  %v1296_v63 = vld [vmem:[%s2582_s7 + $0x38] sm:$0xff] }
 0x24d   : > { %1774 = vmatmul.mubr.msk.f32.gmra.mrb[8].mxu1 %vm521_vm0, %v691_v16  ;;  %v1999_v15 = vpack.c.bf16 %v1296_v63, %v1295_v59  ;;  %v1297_v16 = vld [vmem:[%s2582_s7 + $0x40] sm:$0xff] }
 0x24e   : > { %v2098_v10 = vpop.eup %2097  ;;  %1776 = vmatprep.mubr.msk.f32.mxu1 %vm521_vm0, %v692_v17  ;;  %v1298_v17 = vld [vmem:[%s2582_s7 + $0x48] sm:$0xff] }
 0x24f   : > { %v2100_v18 = vpop.eup %2099  ;;  %v693_v7 = vmul.f32 %v2098_v10, %v2365_v26  ;;  %v1106_v26 = vld [vmem:[%s2580_s5 + $0x8] sm:$0xff]  ;;  %v2003_v10 = vpack.c.bf16 %v1298_v17, %v1297_v16 }
 0x250   : > { %v694_v20 = vmul.f32 %v2100_v18, %v2367_v28  ;;  %v1955_v28 = vpack.c.bf16 %v1106_v26, %v1105_v25  ;;  %v1299_v18 = vld [vmem:[%s2582_s7 + $0x50] sm:$0xff] }
 0x251   : > { %1777 = vmatmul.mubr.msk.f32.gmra.mrb[10].mxu1 %vm521_vm0, %v693_v7  ;;  %v1300_v7 = vld [vmem:[%s2582_s7 + $0x58] sm:$0xff] }
 0x252   : > { %v2102_v8 = vpop.eup %2101  ;;  %1779 = vmatprep.mubr.msk.f32.mxu1 %vm521_vm0, %v694_v20  ;;  %1956 = vmatprep.subr.bf16.mxu0 %v1955_v28  ;;  %v2007_v20 = vpack.c.bf16 %v1300_v7, %v1299_v18 }
 0x253   : > { %v2104_v22 = vpop.eup %2103  ;;  %v695_v19 = vmul.f32 %v2102_v8, %v2379_v34  ;;  %1958 = vmatpush3.bf16.msra.mxu0 %v1955_v28  ;;  %v1963_v34 = vpack.c.bf16 %v1110_v33, %v1109_v32  ;;  %v1301_v8 = vld [vmem:[%s2582_s7 + $0x60] sm:$0xff] }
 0x254   : > { %v696_v21 = vmul.f32 %v2104_v22, %v2381_v36  ;;  %1960 = vmatprep.subr.bf16.mxu0 %v1959_v30  ;;  %v1112_v36 = vld [vmem:[%s2580_s5 + $0x38] sm:$0xff]  ;;  %v1302_v22 = vld [vmem:[%s2582_s7 + $0x68] sm:$0xff] }
 0x255   : > { %1780 = vmatmul.mubr.msk.f32.gmra.mrb[12].mxu1 %vm521_vm0, %v695_v19  ;;  %v1967_v37 = vpack.c.bf16 %v1112_v36, %v1111_v35  ;;  %v2011_v19 = vpack.c.bf16 %v1302_v22, %v1301_v8 }
 0x256   : > { %v2106_v23 = vpop.eup %2105  ;;  %1782 = vmatprep.mubr.msk.f32.mxu1 %vm521_vm0, %v696_v21  ;;  %v1554_v21 = vld [vmem:[%s2579_s4] ss:$0 sm:$0xff] }
 0x257   : > { %v697_v24 = vmul.f32 %v2106_v23, %v2387_v40  ;;  %1962 = vmatpush3.bf16.msra.mxu0 %v1959_v30  ;;  %v1114_v40 = vld [vmem:[%s2580_s5 + $0x48] sm:$0xff] }
 0x258   : > { %1964 = vmatprep.subr.bf16.mxu0 %v1963_v34  ;;  %v1971_v41 = vpack.c.bf16 %v1114_v40, %v1113_v38 }
 0x259   : > { %1783 = vmatmul.mubr.msk.f32.gmra.mrb[14].mxu1 %vm521_vm0, %v697_v24 }
 0x25b   : > { %1966 = vmatpush3.bf16.msra.mxu0 %v1963_v34 }
 0x25c   : > { %1968 = vmatprep.subr.bf16.mxu0 %v1967_v37 }
 0x25f   : > { %1970 = vmatpush3.bf16.msra.mxu0 %v1967_v37 }
 0x260   : > { %1972 = vmatprep.subr.bf16.mxu0 %v1971_v41 }
 0x263   : > { %1974 = vmatpush3.bf16.msra.mxu0 %v1971_v41 }
 0x264   : > { %1976 = vmatprep.subr.bf16.mxu0 %v1975_v45 }
 0x267   : > { %1978 = vmatpush3.bf16.msra.mxu0 %v1975_v45 }
 0x268   : > { %1980 = vmatprep.subr.bf16.mxu0 %v1979_v48 }
 0x26b   : > { %1982 = vmatpush3.bf16.msra.mxu0 %v1979_v48 }
 0x26c   : > { %1984 = vmatprep.subr.bf16.mxu0 %v1983_v5 }
 0x26f   : > { %1986 = vmatpush3.bf16.msra.mxu0 %v1983_v5 }
 0x270   : > { %1988 = vmatprep.subr.bf16.mxu0 %v1987_v49 }
 0x310   : > { %v1763_v50 = vpop.f32.mrb[0].mxu1 }
 0x311   : > { %v820_v51 = vpop.f32.mrb[1].mxu1 }
 0x312   : > { %1787 = vmatprep.mubr.msk.f32.mxu1 %vm907_vm2, %v820_v51 }
 0x313   : > { %1788 = vmatmul.mubr.msk.f32.vlgmr.msra.gmra.mrb[16].mxu1 %vm907_vm2, %v1763_v50 }
 0x314   : > { %v1766_v53 = vpop.f32.mrb[2].mxu1  ;;  %2027 = vmatpush3.bf16.msra.mxu1 %v1987_v49 }
 0x315   : > { %v830_v55 = vpop.f32.mrb[3].mxu1  ;;  %2020 = vmatprep.subr.bf16.mxu1 %v1991_v2 }
 0x316   : > { %1790 = vmatprep.mubr.msk.f32.mxu1 %vm907_vm2, %v830_v55 }
 0x317   : > { %1791 = vmatmul.mubr.msk.f32.gmra.mrb[18].mxu1 %vm907_vm2, %v1766_v53 }
 0x318   : > { %v1769_v56 = vpop.f32.mrb[4].mxu1  ;;  %2028 = vmatpush3.bf16.msra.mxu1 %v1991_v2 }
 0x319   : > { %v840_v54 = vpop.f32.mrb[5].mxu1  ;;  %2021 = vmatprep.subr.bf16.mxu1 %v1995_v14 }
 0x31a   : > { %1793 = vmatprep.mubr.msk.f32.mxu1 %vm907_vm2, %v840_v54 }
 0x31b   : > { %1794 = vmatmul.mubr.msk.f32.gmra.mrb[20].mxu1 %vm907_vm2, %v1769_v56 }
 0x31c   : > { %v1772_v57 = vpop.f32.mrb[6].mxu1  ;;  %2029 = vmatpush3.bf16.msra.mxu1 %v1995_v14 }
 0x31d   : > { %v850_v58 = vpop.f32.mrb[7].mxu1  ;;  %2022 = vmatprep.subr.bf16.mxu1 %v1999_v15 }
 0x31e   : > { %1796 = vmatprep.mubr.msk.f32.mxu1 %vm907_vm2, %v850_v58 }
 0x31f   : > { %1797 = vmatmul.mubr.msk.f32.gmra.mrb[22].mxu1 %vm907_vm2, %v1772_v57 }
 0x320   : > { %v1775_v61 = vpop.f32.mrb[8].mxu1  ;;  %2030 = vmatpush3.bf16.msra.mxu1 %v1999_v15 }
 0x321   : > { %v860_v62 = vpop.f32.mrb[9].mxu1  ;;  %2023 = vmatprep.subr.bf16.mxu1 %v2003_v10 }
 0x322   : > { %1799 = vmatprep.mubr.msk.f32.mxu1 %vm907_vm2, %v860_v62  ;;  %v1303_v62 = vld [vmem:[%s2582_s7 + $0x70] sm:$0xff] }
 0x323   : > { %1800 = vmatmul.mubr.msk.f32.gmra.mrb[24].mxu1 %vm907_vm2, %v1775_v61 }
 0x324   : > { %v1778_v0 = vpop.f32.mrb[10].mxu1  ;;  %2031 = vmatpush3.bf16.msra.mxu1 %v2003_v10 }
 0x325   : > { %v870_v31 = vpop.f32.mrb[11].mxu1  ;;  %2024 = vmatprep.subr.bf16.mxu1 %v2007_v20 }
 0x326   : > { %1802 = vmatprep.mubr.msk.f32.mxu1 %vm907_vm2, %v870_v31 }
 0x327   : > { %1803 = vmatmul.mubr.msk.f32.gmra.mrb[26].mxu1 %vm907_vm2, %v1778_v0  ;;  %v1304_v0 = vld [vmem:[%s2582_s7 + $0x78] sm:$0xff] }
 0x328   : > { %v1781_v3 = vpop.f32.mrb[12].mxu1  ;;  %2032 = vmatpush3.bf16.msra.mxu1 %v2007_v20  ;;  %v2015_v31 = vpack.c.bf16 %v1304_v0, %v1303_v62 }
 0x329   : > { %v880_v4 = vpop.f32.mrb[13].mxu1  ;;  %2025 = vmatprep.subr.bf16.mxu1 %v2011_v19 }
 0x32a   : > { %1805 = vmatprep.mubr.msk.f32.mxu1 %vm907_vm2, %v880_v4 }
 0x32b   : > { %1806 = vmatmul.mubr.msk.f32.gmra.mrb[28].mxu1 %vm907_vm2, %v1781_v3  ;;  %v1572_v3 = vld [vmem:[%s2581_s6] ss:$0 sm:$0xff] }
 0x32c   : > { %v1784_v60 = vpop.f32.mrb[14].mxu1  ;;  %2033 = vmatpush3.bf16.msra.mxu1 %v2011_v19 }
 0x32d   : > { %v890_v39 = vpop.f32.mrb[15].mxu1  ;;  %2026 = vmatprep.subr.bf16.mxu1 %v2015_v31 }
 0x32e   : > { %1808 = vmatprep.mubr.msk.f32.mxu1 %vm907_vm2, %v890_v39 }
 0x32f   : > { %1809 = vmatmul.mubr.msk.f32.gmra.mrb[30].mxu1 %vm907_vm2, %v1784_v60 }
 0x330   : > { %2034 = vmatpush3.bf16.msra.mxu1 %v2015_v31 }
 0x3e6   : > { %v1789_v23 = vpop.f32.mrb[16].mxu1 }
 0x3e7   : > { %v1026_v24 = vpop.f32.mrb[17].mxu1  ;;  %v1032_v26 = vadd.f32 %v1789_v23, %v1554_v21 }
 0x3e8   : > { %v1027_v25 = vadd.f32 %v1554_v21, %v1026_v24 }
 0x3ea   : > { %v1792_v27 = vpop.f32.mrb[18].mxu1  ;;  %1843 = vmatprep.mubr.f32.mxu0 %v1027_v25 }
 0x3eb   : > { %v1036_v28 = vpop.f32.mrb[19].mxu1  ;;  %1844 = vmatmul.mubr.f32.vlgmr.msra.gmra.mrb[16].mxu0 %v1032_v26  ;;  %v1042_v30 = vadd.f32 %v1792_v27, %v1554_v21 }
 0x3ec   : > { %v1037_v29 = vadd.f32 %v1554_v21, %v1036_v28  ;;  %1990 = vmatpush3.bf16.msra.mxu0 %v1987_v49 }
 0x3ed   : > { %1992 = vmatprep.subr.bf16.mxu0 %v1991_v2 }
 0x3ee   : > { %v1795_v32 = vpop.f32.mrb[20].mxu1  ;;  %1846 = vmatprep.mubr.f32.mxu0 %v1037_v29 }
 0x3ef   : > { %v1046_v33 = vpop.f32.mrb[21].mxu1  ;;  %1847 = vmatmul.mubr.f32.gmra.mrb[18].mxu0 %v1042_v30  ;;  %v1052_v35 = vadd.f32 %v1795_v32, %v1554_v21 }
 0x3f0   : > { %v1047_v34 = vadd.f32 %v1554_v21, %v1046_v33  ;;  %1994 = vmatpush3.bf16.msra.mxu0 %v1991_v2 }
 0x3f1   : > { %1996 = vmatprep.subr.bf16.mxu0 %v1995_v14 }
 0x3f2   : > { %v1798_v36 = vpop.f32.mrb[22].mxu1  ;;  %1849 = vmatprep.mubr.f32.mxu0 %v1047_v34 }
 0x3f3   : > { %v1056_v37 = vpop.f32.mrb[23].mxu1  ;;  %1850 = vmatmul.mubr.f32.gmra.mrb[20].mxu0 %v1052_v35  ;;  %v1062_v40 = vadd.f32 %v1798_v36, %v1554_v21 }
 0x3f4   : > { %v1057_v38 = vadd.f32 %v1554_v21, %v1056_v37  ;;  %1998 = vmatpush3.bf16.msra.mxu0 %v1995_v14 }
 0x3f5   : > { %2000 = vmatprep.subr.bf16.mxu0 %v1999_v15 }
 0x3f6   : > { %v1801_v41 = vpop.f32.mrb[24].mxu1  ;;  %1852 = vmatprep.mubr.f32.mxu0 %v1057_v38 }
 0x3f7   : > { %v1066_v43 = vpop.f32.mrb[25].mxu1  ;;  %1853 = vmatmul.mubr.f32.gmra.mrb[22].mxu0 %v1062_v40  ;;  %v1072_v45 = vadd.f32 %v1801_v41, %v1554_v21 }
 0x3f8   : > { %v1067_v44 = vadd.f32 %v1554_v21, %v1066_v43  ;;  %2002 = vmatpush3.bf16.msra.mxu0 %v1999_v15 }
 0x3f9   : > { %2004 = vmatprep.subr.bf16.mxu0 %v2003_v10 }
 0x3fa   : > { %v1804_v46 = vpop.f32.mrb[26].mxu1  ;;  %1855 = vmatprep.mubr.f32.mxu0 %v1067_v44 }
 0x3fb   : > { %v1076_v47 = vpop.f32.mrb[27].mxu1  ;;  %1856 = vmatmul.mubr.f32.gmra.mrb[24].mxu0 %v1072_v45  ;;  %v1082_v50 = vadd.f32 %v1804_v46, %v1554_v21  ;;  %v1573_v46 = vld [vmem:[%s2583_s8] ss:$0 sm:$0xff] }
 0x3fc   : > { %v1077_v48 = vadd.f32 %v1554_v21, %v1076_v47  ;;  %2006 = vmatpush3.bf16.msra.mxu0 %v2003_v10 }
 0x3fd   : > { %2008 = vmatprep.subr.bf16.mxu0 %v2007_v20 }
 0x3fe   : > { %v1807_v51 = vpop.f32.mrb[28].mxu1  ;;  %1858 = vmatprep.mubr.f32.mxu0 %v1077_v48 }
 0x3ff   : > { %v1086_v53 = vpop.f32.mrb[29].mxu1  ;;  %1859 = vmatmul.mubr.f32.gmra.mrb[26].mxu0 %v1082_v50  ;;  %v1092_v56 = vadd.f32 %v1807_v51, %v1554_v21 }
 0x400   : > { %v1087_v55 = vadd.f32 %v1554_v21, %v1086_v53  ;;  %2010 = vmatpush3.bf16.msra.mxu0 %v2007_v20 }
 0x401   : > { %2012 = vmatprep.subr.bf16.mxu0 %v2011_v19 }
 0x402   : > { %v1810_v54 = vpop.f32.mrb[30].mxu1  ;;  %1861 = vmatprep.mubr.f32.mxu0 %v1087_v55 }
 0x403   : > { %v1096_v57 = vpop.f32.mrb[31].mxu1  ;;  %1862 = vmatmul.mubr.f32.gmra.mrb[28].mxu0 %v1092_v56  ;;  %v1102_v61 = vadd.f32 %v1810_v54, %v1554_v21 }
 0x404   : > { %v1097_v58 = vadd.f32 %v1554_v21, %v1096_v57  ;;  %2014 = vmatpush3.bf16.msra.mxu0 %v2011_v19 }
 0x405   : > { %2016 = vmatprep.subr.bf16.mxu0 %v2015_v31 }
 0x406   : > { %1864 = vmatprep.mubr.f32.mxu0 %v1097_v58 }
 0x407   : > { %1865 = vmatmul.mubr.f32.gmra.mrb[30].mxu0 %v1102_v61 }
 0x408   : > { %2018 = vmatpush3.bf16.msra.mxu0 %v2015_v31 }
 0x4be   : > { %v1845_v4 = vpop.f32.mrb[16].mxu0 }
 0x4bf   : > { %v1200_v60 = vadd.f32 %v1845_v4, %v1572_v3  ;;  %v1194_v39 = vpop.f32.mrb[17].mxu0 }
 0x4c0   : > { %v1195_v42 = vadd.f32 %v1572_v3, %v1194_v39 }
 0x4c1   : > { %v1274_v6 = vmax.f32 %v1200_v60, 0.0 }
 0x4c2   : > { %v1273_v1 = vmax.f32 %v1195_v42, 0.0  ;;  %v1848_v5 = vpop.f32.mrb[18].mxu0 }
 0x4c3   : > { %v1210_v9 = vadd.f32 %v1848_v5, %v1572_v3  ;;  %v1204_v11 = vpop.f32.mrb[19].mxu0 }
 0x4c4   : > { %v1205_v49 = vadd.f32 %v1572_v3, %v1204_v11  ;;  %1899 = vmatprep.mubr.f32.mxu0 %v1273_v1 }
 0x4c5   : > { %1900 = vmatmul.mubr.f32.vlgmr.msra.gmra.mrb[32].mxu0 %v1274_v6  ;;  %v1276_v12 = vmax.f32 %v1210_v9, 0.0 }
 0x4c6   : > { %v1275_v52 = vmax.f32 %v1205_v49, 0.0  ;;  %v1851_v2 = vpop.f32.mrb[20].mxu0 }
 0x4c7   : > { %v1220_v13 = vadd.f32 %v1851_v2, %v1572_v3  ;;  %v1214_v14 = vpop.f32.mrb[21].mxu0 }
 0x4c8   : > { %v1215_v59 = vadd.f32 %v1572_v3, %v1214_v14  ;;  %1902 = vmatprep.mubr.f32.mxu0 %v1275_v52 }
 0x4c9   : > { %1903 = vmatmul.mubr.f32.gmra.mrb[34].mxu0 %v1276_v12  ;;  %v1278_v16 = vmax.f32 %v1220_v13, 0.0 }
 0x4ca   : > { %v1277_v63 = vmax.f32 %v1215_v59, 0.0  ;;  %v1854_v15 = vpop.f32.mrb[22].mxu0 }
 0x4cb   : > { %v1230_v17 = vadd.f32 %v1854_v15, %v1572_v3  ;;  %v1224_v10 = vpop.f32.mrb[23].mxu0 }
 0x4cc   : > { %v1225_v18 = vadd.f32 %v1572_v3, %v1224_v10  ;;  %1905 = vmatprep.mubr.f32.mxu1 %v1277_v63 }
 0x4cd   : > { %1906 = vmatmul.mubr.f32.vlgmr.msra.gmra.mrb[32].mxu1 %v1278_v16  ;;  %v1280_v8 = vmax.f32 %v1230_v17, 0.0 }
 0x4ce   : > { %v1279_v7 = vmax.f32 %v1225_v18, 0.0  ;;  %v1857_v20 = vpop.f32.mrb[24].mxu0 }
 0x4cf   : > { %v1240_v22 = vadd.f32 %v1857_v20, %v1572_v3  ;;  %v1234_v19 = vpop.f32.mrb[25].mxu0 }
 0x4d0   : > { %v1235_v21 = vadd.f32 %v1572_v3, %v1234_v19  ;;  %1908 = vmatprep.mubr.f32.mxu1 %v1279_v7 }
 0x4d1   : > { %1909 = vmatmul.mubr.f32.gmra.mrb[34].mxu1 %v1280_v8  ;;  %v1282_v25 = vmax.f32 %v1240_v22, 0.0 }
 0x4d2   : > { %v1281_v23 = vmax.f32 %v1235_v21, 0.0  ;;  %v1860_v24 = vpop.f32.mrb[26].mxu0 }
 0x4d3   : > { %v1250_v26 = vadd.f32 %v1860_v24, %v1572_v3  ;;  %v1244_v27 = vpop.f32.mrb[27].mxu0 }
 0x4d4   : > { %v1245_v28 = vadd.f32 %v1572_v3, %v1244_v27  ;;  %1911 = vmatprep.mubr.f32.mxu1 %v1281_v23 }
 0x4d5   : > { %1912 = vmatmul.mubr.f32.gmra.mrb[36].mxu1 %v1282_v25  ;;  %v1284_v32 = vmax.f32 %v1250_v26, 0.0 }
 0x4d6   : > { %v1283_v29 = vmax.f32 %v1245_v28, 0.0  ;;  %v1863_v30 = vpop.f32.mrb[28].mxu0 }
 0x4d7   : > { %v1260_v33 = vadd.f32 %v1863_v30, %v1572_v3  ;;  %v1254_v34 = vpop.f32.mrb[29].mxu0 }
 0x4d8   : > { %v1255_v35 = vadd.f32 %v1572_v3, %v1254_v34  ;;  %1914 = vmatprep.mubr.f32.mxu1 %v1283_v29 }
 0x4d9   : > { %1915 = vmatmul.mubr.f32.gmra.mrb[38].mxu1 %v1284_v32  ;;  %v1286_v38 = vmax.f32 %v1260_v33, 0.0 }
 0x4da   : > { %v1285_v36 = vmax.f32 %v1255_v35, 0.0  ;;  %v1866_v37 = vpop.f32.mrb[30].mxu0 }
 0x4db   : > { %v1270_v40 = vadd.f32 %v1866_v37, %v1572_v3  ;;  %v1264_v41 = vpop.f32.mrb[31].mxu0 }
 0x4dc   : > { %v1265_v43 = vadd.f32 %v1572_v3, %v1264_v41  ;;  %1917 = vmatprep.mubr.f32.mxu1 %v1285_v36 }
 0x4dd   : > { %1918 = vmatmul.mubr.f32.gmra.mrb[40].mxu1 %v1286_v38  ;;  %v1288_v45 = vmax.f32 %v1270_v40, 0.0 }
 0x4de   : > { %v1287_v44 = vmax.f32 %v1265_v43, 0.0 }
 0x4e0   : > { %1920 = vmatprep.mubr.f32.mxu1 %v1287_v44 }
 0x4e1   : > { %1921 = vmatmul.mubr.f32.gmra.mrb[42].mxu1 %v1288_v45 }
 0x598   : > { %v1901_v47 = vpop.f32.mrb[32].mxu0 }
 0x599   : > { %v1384_v48 = vadd.f32 %v1901_v47, %v1573_v46  ;;  %v1378_v50 = vpop.f32.mrb[33].mxu0 }
 0x59a   : > { %v1379_v51 = vadd.f32 %v1573_v46, %v1378_v50 }
 0x59b   : > { %1458 = vst [vmem:[%s2554_s12 + $0x8] sm:$0xff] %v1384_v48 }
 0x59c   : > { %1457 = vst [vmem:[%s2554_s12] sm:$0xff] %v1379_v51  ;;  %v1904_v53 = vpop.f32.mrb[34].mxu0 }
 0x59d   : > { %v1394_v55 = vadd.f32 %v1904_v53, %v1573_v46  ;;  %v1388_v56 = vpop.f32.mrb[35].mxu0 }
 0x59e   : > { %v1389_v54 = vadd.f32 %v1573_v46, %v1388_v56 }
 0x59f   : > { %1460 = vst [vmem:[%s2554_s12 + $0x18] sm:$0xff] %v1394_v55 }
 0x5a0   : > { %1459 = vst [vmem:[%s2554_s12 + $0x10] sm:$0xff] %v1389_v54  ;;  %v1907_v57 = vpop.f32.mrb[32].mxu1 }
 0x5a1   : > { %v1404_v58 = vadd.f32 %v1907_v57, %v1573_v46  ;;  %v1398_v61 = vpop.f32.mrb[33].mxu1 }
 0x5a2   : > { %v1399_v62 = vadd.f32 %v1573_v46, %v1398_v61 }
 0x5a3   : > { %1462 = vst [vmem:[%s2554_s12 + $0x28] sm:$0xff] %v1404_v58 }
 0x5a4   : > { %1461 = vst [vmem:[%s2554_s12 + $0x20] sm:$0xff] %v1399_v62  ;;  %v1910_v0 = vpop.f32.mrb[34].mxu1 }
 0x5a5   : > { %v1414_v31 = vadd.f32 %v1910_v0, %v1573_v46  ;;  %v1408_v3 = vpop.f32.mrb[35].mxu1 }
 0x5a6   : > { %v1409_v4 = vadd.f32 %v1573_v46, %v1408_v3 }
 0x5a7   : > { %1464 = vst [vmem:[%s2554_s12 + $0x38] sm:$0xff] %v1414_v31 }
 0x5a8   : > { %1463 = vst [vmem:[%s2554_s12 + $0x30] sm:$0xff] %v1409_v4  ;;  %v1913_v60 = vpop.f32.mrb[36].mxu1 }
 0x5a9   : > { %v1424_v39 = vadd.f32 %v1913_v60, %v1573_v46  ;;  %v1418_v42 = vpop.f32.mrb[37].mxu1 }
 0x5aa   : > { %v1419_v1 = vadd.f32 %v1573_v46, %v1418_v42 }
 0x5ab   : > { %1466 = vst [vmem:[%s2554_s12 + $0x48] sm:$0xff] %v1424_v39 }
 0x5ac   : > { %1465 = vst [vmem:[%s2554_s12 + $0x40] sm:$0xff] %v1419_v1  ;;  %v1916_v5 = vpop.f32.mrb[38].mxu1 }
 0x5ad   : > { %v1434_v6 = vadd.f32 %v1916_v5, %v1573_v46  ;;  %v1428_v9 = vpop.f32.mrb[39].mxu1 }
 0x5ae   : > { %v1429_v11 = vadd.f32 %v1573_v46, %v1428_v9 }
 0x5af   : > { %1468 = vst [vmem:[%s2554_s12 + $0x58] sm:$0xff] %v1434_v6 }
 0x5b0   : > { %1467 = vst [vmem:[%s2554_s12 + $0x50] sm:$0xff] %v1429_v11  ;;  %v1919_v49 = vpop.f32.mrb[40].mxu1 }
 0x5b1   : > { %v1444_v52 = vadd.f32 %v1919_v49, %v1573_v46  ;;  %v1438_v2 = vpop.f32.mrb[41].mxu1 }
 0x5b2   : > { %v1439_v12 = vadd.f32 %v1573_v46, %v1438_v2 }
 0x5b3   : > { %1470 = vst [vmem:[%s2554_s12 + $0x68] sm:$0xff] %v1444_v52 }
 0x5b4   : > { %1469 = vst [vmem:[%s2554_s12 + $0x60] sm:$0xff] %v1439_v12  ;;  %v1922_v13 = vpop.f32.mrb[42].mxu1 }
 0x5b5   : > { %v1454_v14 = vadd.f32 %v1922_v13, %v1573_v46  ;;  %v1448_v59 = vpop.f32.mrb[43].mxu1 }
 0x5b6   : > { %v1449_v63 = vadd.f32 %v1573_v46, %v1448_v59 }
 0x5b7   : > { %1472 = vst [vmem:[%s2554_s12 + $0x78] sm:$0xff] %v1454_v14 }
 0x5b8   : > { %1471 = vst [vmem:[%s2554_s12 + $0x70] sm:$0xff] %v1449_v63 }
 0x5b9 PF: > { %s19_s30 = sadd.s32 1, %s2113_s30  }
 0x5ba   : > { %p16_p4 = scmp.ge.s32.totalorder %s19_s30, 4  }
 0x5bc   :  { %18 = sbr.rel (!%p16_p4) target bundleno = 1 (0x1), region = 86 }

</bundles_post_ra>
